<compile_context>
chip_gen: v5e
topology: v5e:2x2
jax: 0.10.0
libtpu: 0.0.40
codegen_flags: <defaults>
</compile_context>

<pallas_src>
import math
import functools

import jax
import jax.numpy as jnp
import numpy as np
from jax.experimental import pallas as pl
from jax.experimental.pallas import tpu as pltpu


_NEG_BIAS = jnp.float32(-1e30)   # finite "-inf": keeps fully-masked rows NaN-free


# ----------------------------- kernel helpers -----------------------------

def _layer_norm(x, g, b, eps=1e-5):
    mean = jnp.mean(x, axis=-1, keepdims=True)
    var = jnp.mean(jnp.square(x - mean), axis=-1, keepdims=True)
    return (x - mean) * jax.lax.rsqrt(var + eps) * g + b


# ----------------------- fused encoder-stack kernel ------------------------

def _encoder_stack_kernel(*refs, num_heads, normalize_before, has_pad, has_src,
                          apply_final_ln, approx_recip, kv_block):
    it = iter(refs)
    x_ref = next(it)
    pad_ref = next(it) if has_pad else None
    src_ref = next(it) if has_src else None
    wqkv_ref = next(it); bqkv_ref = next(it)
    wo_ref = next(it);   bo_ref = next(it)
    ln1g_ref = next(it); ln1b_ref = next(it)
    fc1w_ref = next(it); fc1b_ref = next(it)
    fc2w_ref = next(it); fc2b_ref = next(it)
    ln2g_ref = next(it); ln2b_ref = next(it)
    if apply_final_ln:
        flng_ref = next(it); flnb_ref = next(it)
    o_ref = next(it)

    l_idx = pl.program_id(1)
    n_layers = pl.num_programs(1)

    # The activation for this whole batch tile is carried in the resident output block.
    @pl.when(l_idx == 0)
    def _():
        o_ref[...] = x_ref[...]

    xt = o_ref[...].astype(jnp.float32)          # (Bt, S, E)
    Bt, S, E = xt.shape
    H = num_heads
    Dh = E // H
    md = wqkv_ref.dtype                          # matmul operand dtype
    n_kv = S // kv_block

    x = xt.reshape(Bt * S, E)                    # rows ordered (b, s) - free merge

    ln1_g, ln1_b = ln1g_ref[0], ln1b_ref[0]      # (1, E)
    ln2_g, ln2_b = ln2g_ref[0], ln2b_ref[0]

    def rowmm(a, w_ref, b_ref):                  # (R, in) @ (in, out) + (1, out)
        return jax.lax.dot_general(a.astype(md), w_ref[0],
                                   (((1,), (0,)), ((), ())),
                                   preferred_element_type=jnp.float32) + b_ref[0]

    # ---------------- self-attention block ----------------
    residual = x
    h = _layer_norm(x, ln1_g, ln1_b) if normalize_before else x

    qkv = rowmm(h, wqkv_ref, bqkv_ref)           # (Bt*S, 3E); q-scale pre-folded

    def to_heads(t):                             # (Bt*S, E) -> (H*Bt, S, Dh)
        t = jnp.swapaxes(t.reshape(Bt * S, H, Dh), 0, 1)   # (H, Bt*S, Dh)
        return t.reshape(H * Bt, S, Dh)

    qh = to_heads(qkv[:, :E]).astype(md)
    kh = to_heads(qkv[:, E:2 * E]).astype(md)
    vh = to_heads(qkv[:, 2 * E:]).astype(md)

    pad_bias = pad_ref[...] if has_pad else None        # (Bt, 1, S) additive
    src_bias = src_ref[...] if has_src else None        # (S, S) additive

    # Online-softmax (flash-style) over KV chunks: live state bounded by
    # (H*Bt, S, kv_block) regardless of sequence length.
    m_i = jnp.full((H * Bt, S, 1), jnp.finfo(jnp.float32).min, jnp.float32)
    l_i = jnp.zeros((H * Bt, S, 1), jnp.float32)
    acc = jnp.zeros((H * Bt, S, Dh), jnp.float32)
    for c in range(n_kv):
        lo = c * kv_block
        hi = lo + kv_block
        s = jnp.einsum("nsd,ntd->nst", qh, kh[:, lo:hi, :],
                       preferred_element_type=jnp.float32)      # (H*Bt, S, Tk)
        if has_src or has_pad:
            s4 = s.reshape(H, Bt, S, kv_block)                  # free split
            if has_src:
                s4 = s4 + src_bias[:, lo:hi][None, None, :, :]
            if has_pad:
                s4 = s4 + pad_bias[:, :, lo:hi][None, :, :, :]
            s = s4.reshape(H * Bt, S, kv_block)                 # free merge
        m_new = jnp.maximum(m_i, jnp.max(s, axis=-1, keepdims=True))
        alpha = jnp.exp(m_i - m_new)
        p = jnp.exp(s - m_new)
        l_i = alpha * l_i + jnp.sum(p, axis=-1, keepdims=True)
        acc = alpha * acc + jnp.einsum("nst,ntd->nsd", p.astype(md),
                                       vh[:, lo:hi, :],
                                       preferred_element_type=jnp.float32)
        m_i = m_new

    ctx = acc * pl.reciprocal(l_i, approx=approx_recip)         # (H*Bt, S, Dh)
    ctx = jnp.swapaxes(ctx.reshape(H, Bt * S, Dh), 0, 1).reshape(Bt * S, E)

    attn = rowmm(ctx, wo_ref, bo_ref)                           # output projection

    x = residual + attn
    if not normalize_before:
        x = _layer_norm(x, ln1_g, ln1_b)

    # ---------------- feed-forward block ----------------
    residual = x
    h = _layer_norm(x, ln2_g, ln2_b) if normalize_before else x
    f = jnp.maximum(rowmm(h, fc1w_ref, fc1b_ref), 0.0)          # ReLU
    f = rowmm(f, fc2w_ref, fc2b_ref)
    x = residual + f
    if not normalize_before:
        x = _layer_norm(x, ln2_g, ln2_b)

    o_ref[...] = x.reshape(Bt, S, E)

    if apply_final_ln:
        @pl.when(l_idx == n_layers - 1)
        def _():
            o_ref[...] = _layer_norm(x, flng_ref[...], flnb_ref[...]
                                     ).reshape(Bt, S, E)


# ------------------------------- wrapper -----------------------------------

def _pick_batch_tile(B, S):
    # Aim for Bt*S >= 256 rows to fill the 256x256 MXU on v6e/v7x (128 on v5e),
    # without exceeding the batch.
    return max(1, min(B, max(1, 256 // max(S, 1))))


def _pick_kv_block(S, kv_block):
    if kv_block is None:
        kv_block = min(S, 512)
    if S % kv_block != 0:
        kv_block = S
    return int(kv_block)


def _vmem_limit_bytes():
    # Raise the scoped-VMEM limit above the 16/32 MiB defaults; stay under the
    # physical capacity (64 MiB on v7x, 128 MiB on v5e/v6e).
    try:
        cap = int(pltpu.get_tpu_info().vmem_capacity_bytes)
    except Exception:
        cap = 64 * 1024 * 1024
    return int(min(int(cap * 0.85), 100 * 1024 * 1024))


def _pack_params(params, *, num_heads, matmul_dtype):
    """Stack per-layer weights into (L, ...) arrays, pre-transposed to (in, out),
    with the q scaling folded into Wq / bq."""
    layers = params["layers"]
    E = layers[0]["wq"].shape[0]
    scale = (E // num_heads) ** -0.5

    def stack(fn, dtype):
        return jnp.stack([fn(lp) for lp in layers], axis=0).astype(dtype)

    return dict(
        wqkv=stack(lambda lp: jnp.concatenate(
            [lp["wq"].T * scale, lp["wk"].T, lp["wv"].T], axis=1), matmul_dtype),
        bqkv=stack(lambda lp: jnp.concatenate(
            [lp["bq"] * scale, lp["bk"], lp["bv"]], axis=1), jnp.float32),
        wo=stack(lambda lp: lp["wo"].T, matmul_dtype),
        bo=stack(lambda lp: lp["bo"], jnp.float32),
        ln1_g=stack(lambda lp: lp["ln1_g"], jnp.float32),
        ln1_b=stack(lambda lp: lp["ln1_b"], jnp.float32),
        fc1_w=stack(lambda lp: lp["fc1_w"].T, matmul_dtype),
        fc1_b=stack(lambda lp: lp["fc1_b"], jnp.float32),
        fc2_w=stack(lambda lp: lp["fc2_w"].T, matmul_dtype),
        fc2_b=stack(lambda lp: lp["fc2_b"], jnp.float32),
        ln2_g=stack(lambda lp: lp["ln2_g"], jnp.float32),
        ln2_b=stack(lambda lp: lp["ln2_b"], jnp.float32),
    )


def transformer_encoder_forward(x, params, *, num_heads, normalize_before,
                                src_mask=None, encoder_padding_mask=None,
                                matmul_dtype=jnp.bfloat16, batch_tile=None,
                                kv_block=None):
    """x: (S, B, E) float32.  Returns (S, B, E) float32 (eval-mode forward)."""
    S, B, E = x.shape
    L = len(params["layers"])
    F = params["layers"][0]["fc1_w"].shape[0]
    H = num_heads

    # One transpose in XLA: kernel-internal layout is (batch, seq, embed).
    xb = jnp.transpose(x.astype(jnp.float32), (1, 0, 2))        # (B, S, E)

    Bt = int(batch_tile) if batch_tile is not None else _pick_batch_tile(B, S)
    Bp = int(pl.cdiv(B, Bt)) * Bt
    if Bp != B:                                                 # pad batch to tile multiple
        xb = jnp.pad(xb, ((0, Bp - B), (0, 0), (0, 0)))

    kv_block_ = _pick_kv_block(S, kv_block)

    has_pad = encoder_padding_mask is not None
    has_src = src_mask is not None
    apply_final_ln = params["final_ln"] is not None
    approx_recip = jnp.dtype(matmul_dtype) != jnp.dtype(jnp.float32)

    packed = _pack_params(params, num_heads=num_heads, matmul_dtype=matmul_dtype)

    args = [xb]
    in_specs = [pl.BlockSpec((Bt, S, E), lambda b, l: (b, 0, 0))]
    if has_pad:
        # (B, 1, S) additive key bias; the (B, S, S) bias tensor is never materialized.
        key_bias = jnp.where(encoder_padding_mask.astype(bool), _NEG_BIAS,
                             jnp.float32(0.0)).astype(jnp.float32)
        if Bp != B:
            key_bias = jnp.pad(key_bias, ((0, Bp - B), (0, 0)))
        args.append(key_bias.reshape(Bp, 1, S))
        in_specs.append(pl.BlockSpec((Bt, 1, S), lambda b, l: (b, 0, 0)))
    if has_src:
        args.append(src_mask.astype(jnp.float32))               # (S, S) additive
        in_specs.append(pl.BlockSpec((S, S), lambda b, l: (0, 0)))

    def _layer_spec(a):      # (L, d1, d2) stacked weights; one layer slab per step
        return pl.BlockSpec((1, a.shape[1], a.shape[2]), lambda b, l: (l, 0, 0))

    for name in ("wqkv", "bqkv", "wo", "bo", "ln1_g", "ln1_b",
                 "fc1_w", "fc1_b", "fc2_w", "fc2_b", "ln2_g", "ln2_b"):
        a = packed[name]
        args.append(a)
        in_specs.append(_layer_spec(a))
    if apply_final_ln:
        fg, fb = params["final_ln"]
        args += [fg.astype(jnp.float32), fb.astype(jnp.float32)]
        in_specs += [pl.BlockSpec((1, E), lambda b, l: (0, 0)),
                     pl.BlockSpec((1, E), lambda b, l: (0, 0))]

    kernel = functools.partial(_encoder_stack_kernel,
                               num_heads=num_heads,
                               normalize_before=normalize_before,
                               has_pad=has_pad, has_src=has_src,
                               apply_final_ln=apply_final_ln,
                               approx_recip=approx_recip,
                               kv_block=kv_block_)

    # Advisory cost estimate so XLA schedules surrounding ops around the kernel.
    w_itemsize = jnp.dtype(matmul_dtype).itemsize
    flops = 2 * B * L * S * (4 * E * E + 2 * E * F + 2 * S * E)
    transcendentals = B * L * S * (H * S + 6)
    layer_w_bytes = w_itemsize * (4 * E * E + 2 * E * F) + 4 * (9 * E + F)
    bytes_accessed = (Bp // Bt) * L * layer_w_bytes + 2 * Bp * S * E * 4

    out = pl.pallas_call(
        kernel,
        out_shape=jax.ShapeDtypeStruct((Bp, S, E), jnp.float32),
        grid=(Bp // Bt, L),
        in_specs=in_specs,
        out_specs=pl.BlockSpec((Bt, S, E), lambda b, l: (b, 0, 0)),
        input_output_aliases={0: 0},    # activation buffer donated to the output
        compiler_params=pltpu.CompilerParams(
            dimension_semantics=("parallel", "arbitrary"),
            vmem_limit_bytes=_vmem_limit_bytes()),
        cost_estimate=pl.CostEstimate(flops=int(flops),
                                      transcendentals=int(transcendentals),
                                      bytes_accessed=int(bytes_accessed)),
    )(*args)

    out = out[:B] if Bp != B else out
    return jnp.transpose(out, (1, 0, 2))


# --------------------------- parameter init ---------------------------------

def _xavier(key, out_f, in_f):
    bound = math.sqrt(6.0 / (in_f + out_f))
    return jax.random.uniform(key, (out_f, in_f), jnp.float32, -bound, bound)


def init_params(key, *, embed_dim, ffn_dim, num_heads, num_layers,
                normalize_before):
    E, F = embed_dim, ffn_dim
    layers = []
    for _ in range(num_layers):
        key, k_in, k_out, k_f1, k_f2 = jax.random.split(key, 5)
        in_proj = _xavier(k_in, 3 * E, E)   # torch MHA stacked in_proj init
        wq, wk, wv = in_proj[:E], in_proj[E:2 * E], in_proj[2 * E:]
        layers.append(dict(
            wq=wq, bq=jnp.zeros((1, E), jnp.float32),
            wk=wk, bk=jnp.zeros((1, E), jnp.float32),
            wv=wv, bv=jnp.zeros((1, E), jnp.float32),
            wo=_xavier(k_out, E, E), bo=jnp.zeros((1, E), jnp.float32),
            ln1_g=jnp.ones((1, E), jnp.float32), ln1_b=jnp.zeros((1, E), jnp.float32),
            fc1_w=_xavier(k_f1, F, E), fc1_b=jnp.zeros((1, F), jnp.float32),
            fc2_w=_xavier(k_f2, E, F), fc2_b=jnp.zeros((1, E), jnp.float32),
            ln2_g=jnp.ones((1, E), jnp.float32), ln2_b=jnp.zeros((1, E), jnp.float32),
        ))
    final_ln = ((jnp.ones((1, E), jnp.float32), jnp.zeros((1, E), jnp.float32))
                if normalize_before else None)
    return {"layers": layers, "final_ln": final_ln}


# --------------------------- pure-JAX reference ------------------------------

def _build_attn_bias(src_mask, encoder_padding_mask, B, S):
    if src_mask is None and encoder_padding_mask is None:
        return None
    bias = jnp.zeros((B, S, S), jnp.float32)
    if src_mask is not None:
        bias = bias + src_mask.astype(jnp.float32)[None, :, :]
    if encoder_padding_mask is not None:
        bias = jnp.where(encoder_padding_mask[:, None, :].astype(bool),
                         jnp.float32(-jnp.inf), bias)
    return bias


def reference_forward(x, params, *, num_heads, normalize_before,
                      src_mask=None, encoder_padding_mask=None):
    def ln(v, g, b, eps=1e-5):
        mu = v.mean(-1, keepdims=True)
        var = ((v - mu) ** 2).mean(-1, keepdims=True)
        return (v - mu) / jnp.sqrt(var + eps) * g + b

    S, B, E = x.shape
    H = num_heads
    Dh = E // H
    bias = _build_attn_bias(src_mask, encoder_padding_mask, B, S)
    for lp in params["layers"]:
        residual = x
        h = ln(x, lp["ln1_g"], lp["ln1_b"]) if normalize_before else x
        q = jnp.einsum("sbe,oe->sbo", h, lp["wq"]) + lp["bq"]
        k = jnp.einsum("sbe,oe->sbo", h, lp["wk"]) + lp["bk"]
        v = jnp.einsum("sbe,oe->sbo", h, lp["wv"]) + lp["bv"]
        q = q.reshape(S, B, H, Dh) * (Dh ** -0.5)
        k = k.reshape(S, B, H, Dh)
        v = v.reshape(S, B, H, Dh)
        scores = jnp.einsum("sbhd,tbhd->bhst", q, k)
        if bias is not None:
            scores = scores + bias[:, None, :, :]
        p = jax.nn.softmax(scores, axis=-1)
        ctx = jnp.einsum("bhst,tbhd->sbhd", p, v).reshape(S, B, E)
        attn = jnp.einsum("sbe,oe->sbo", ctx, lp["wo"]) + lp["bo"]
        x = residual + attn
        if not normalize_before:
            x = ln(x, lp["ln1_g"], lp["ln1_b"])
        residual = x
        h = ln(x, lp["ln2_g"], lp["ln2_b"]) if normalize_before else x
        f = jax.nn.relu(jnp.einsum("sbe,oe->sbo", h, lp["fc1_w"]) + lp["fc1_b"])
        f = jnp.einsum("sbf,of->sbo", f, lp["fc2_w"]) + lp["fc2_b"]
        x = residual + f
        if not normalize_before:
            x = ln(x, lp["ln2_g"], lp["ln2_b"])
    if params["final_ln"] is not None:
        g, b = params["final_ln"]
        x = ln(x, g, b)
    return x


# ----------------------------------- main ------------------------------------

if __name__ == "__main__":
    # small config: seq=8, batch=2, embed=32, heads=4, ffn=64, layers=2
    S, B, E = 8, 2, 32
    H, F, L = 4, 64, 2
    NORMALIZE_BEFORE = True
    # attention_dropout = dropout = 0.0 -> dropout is identity (eval semantics)

    key = jax.random.PRNGKey(0)
    k_x, k_p, k_m = jax.random.split(key, 3)
    x = jax.random.normal(k_x, (S, B, E), jnp.float32)
    params = init_params(k_p, embed_dim=E, ffn_dim=F, num_heads=H,
                         num_layers=L, normalize_before=NORMALIZE_BEFORE)

    # padding mask: batch element 1 has its last two key positions padded
    pad_mask = jnp.zeros((B, S), jnp.bool_).at[1, S - 2:].set(True)
    # additive (S, S) attention mask with small finite values
    attn_mask = 0.1 * jax.random.normal(k_m, (S, S), jnp.float32)

    checks = [
        ("f32 / no mask",       jnp.float32,  None,      None,     2e-3),
        ("bf16 / no mask",      jnp.bfloat16, None,      None,     5e-2),
        ("bf16 / pad mask",     jnp.bfloat16, None,      pad_mask, 5e-2),
        ("bf16 / src+pad mask", jnp.bfloat16, attn_mask, pad_mask, 5e-2),
    ]
    for name, md, sm, pm, tol in checks:
        fwd = jax.jit(functools.partial(
            transformer_encoder_forward, num_heads=H,
            normalize_before=NORMALIZE_BEFORE, matmul_dtype=md))
        out = jax.block_until_ready(fwd(x, params, src_mask=sm,
                                        encoder_padding_mask=pm))
        ref = jax.block_until_ready(reference_forward(
            x, params, num_heads=H, normalize_before=NORMALIZE_BEFORE,
            src_mask=sm, encoder_padding_mask=pm))
        assert out.shape == (S, B, E)
        if not np.allclose(np.asarray(out), np.asarray(ref), atol=tol, rtol=tol):
            err = float(np.max(np.abs(np.asarray(out) - np.asarray(ref))))
            raise AssertionError(f"{name}: mismatch vs reference (max abs err {err})")

    print("KERNEL_OK")
</pallas_src>

<mosaic_0001>
module attributes {stable_mosaic.version = 11 : i64} {
  func.func @_encoder_stack_kernel(%arg0: i32, %arg1: i32, %arg2: memref<2x8x32xf32, #tpu.memory_space<vmem>>, %arg3: memref<1x32x96xf32, #tpu.memory_space<vmem>>, %arg4: memref<1x1x96xf32, #tpu.memory_space<vmem>>, %arg5: memref<1x32x32xf32, #tpu.memory_space<vmem>>, %arg6: memref<1x1x32xf32, #tpu.memory_space<vmem>>, %arg7: memref<1x1x32xf32, #tpu.memory_space<vmem>>, %arg8: memref<1x1x32xf32, #tpu.memory_space<vmem>>, %arg9: memref<1x32x64xf32, #tpu.memory_space<vmem>>, %arg10: memref<1x1x64xf32, #tpu.memory_space<vmem>>, %arg11: memref<1x64x32xf32, #tpu.memory_space<vmem>>, %arg12: memref<1x1x32xf32, #tpu.memory_space<vmem>>, %arg13: memref<1x1x32xf32, #tpu.memory_space<vmem>>, %arg14: memref<1x1x32xf32, #tpu.memory_space<vmem>>, %arg15: memref<1x32xf32, #tpu.memory_space<vmem>>, %arg16: memref<1x32xf32, #tpu.memory_space<vmem>>, %arg17: memref<2x8x32xf32, #tpu.memory_space<vmem>>) attributes {dimension_semantics = [#tpu.dimension_semantics<parallel>, #tpu.dimension_semantics<arbitrary>], iteration_bounds = array<i64: 1, 2>, scalar_prefetch = 0 : i64, scratch_operands = 0 : i64, tpu.core_type = #tpu.core_type<tc>, window_params = [{transform_indices = @transform_0, window_bounds = array<i64: 2, 8, 32>}, {transform_indices = @transform_1, window_bounds = array<i64: 1, 32, 96>}, {transform_indices = @transform_2, window_bounds = array<i64: 1, 1, 96>}, {transform_indices = @transform_3, window_bounds = array<i64: 1, 32, 32>}, {transform_indices = @transform_4, window_bounds = array<i64: 1, 1, 32>}, {transform_indices = @transform_5, window_bounds = array<i64: 1, 1, 32>}, {transform_indices = @transform_6, window_bounds = array<i64: 1, 1, 32>}, {transform_indices = @transform_7, window_bounds = array<i64: 1, 32, 64>}, {transform_indices = @transform_8, window_bounds = array<i64: 1, 1, 64>}, {transform_indices = @transform_9, window_bounds = array<i64: 1, 64, 32>}, {transform_indices = @transform_10, window_bounds = array<i64: 1, 1, 32>}, {transform_indices = @transform_11, window_bounds = array<i64: 1, 1, 32>}, {transform_indices = @transform_12, window_bounds = array<i64: 1, 1, 32>}, {pipeline_mode = #tpu.pipeline_mode<synchronous>, transform_indices = @transform_13, window_bounds = array<i64: 1, 32>}, {pipeline_mode = #tpu.pipeline_mode<synchronous>, transform_indices = @transform_14, window_bounds = array<i64: 1, 32>}, {transform_indices = @transform_15, window_bounds = array<i64: 2, 8, 32>}]} {
    %c0_i32 = arith.constant 0 : i32
    %0 = arith.cmpi eq, %arg1, %c0_i32 : i32
    %1 = arith.extui %0 : i1 to i32
    %c0_i32_0 = arith.constant 0 : i32
    %2 = arith.cmpi ne, %1, %c0_i32_0 : i32
    scf.if %2 {
      %c0_64 = arith.constant 0 : index
      %c0_65 = arith.constant 0 : index
      %c0_66 = arith.constant 0 : index
      %132 = vector.load %arg2[%c0_64, %c0_65, %c0_66] : memref<2x8x32xf32, #tpu.memory_space<vmem>>, vector<2x8x32xf32>
      %c0_67 = arith.constant 0 : index
      %c0_68 = arith.constant 0 : index
      %c0_69 = arith.constant 0 : index
      %133 = vector.load %arg17[%c0_67, %c0_68, %c0_69] : memref<2x8x32xf32, #tpu.memory_space<vmem>>, vector<2x8x32xf32>
      tpu.vector_store %arg17[%c0_67, %c0_68, %c0_69], %132 {strides = array<i32>} : memref<2x8x32xf32, #tpu.memory_space<vmem>>, vector<2x8x32xf32>,
    } else {
    }
    %c0 = arith.constant 0 : index
    %c0_1 = arith.constant 0 : index
    %c0_2 = arith.constant 0 : index
    %3 = vector.load %arg17[%c0, %c0_1, %c0_2] : memref<2x8x32xf32, #tpu.memory_space<vmem>>, vector<2x8x32xf32>
    %4 = vector.shape_cast %3 : vector<2x8x32xf32> to vector<16x32xf32>
    %c0_3 = arith.constant 0 : index
    %c0_4 = arith.constant 0 : index
    %c0_5 = arith.constant 0 : index
    %5 = vector.load %arg7[%c0_3, %c0_4, %c0_5] : memref<1x1x32xf32, #tpu.memory_space<vmem>>, vector<1x1x32xf32>
    %6 = vector.shape_cast %5 : vector<1x1x32xf32> to vector<1x32xf32>
    %c0_6 = arith.constant 0 : index
    %c0_7 = arith.constant 0 : index
    %c0_8 = arith.constant 0 : index
    %7 = vector.load %arg8[%c0_6, %c0_7, %c0_8] : memref<1x1x32xf32, #tpu.memory_space<vmem>>, vector<1x1x32xf32>
    %8 = vector.shape_cast %7 : vector<1x1x32xf32> to vector<1x32xf32>
    %c0_9 = arith.constant 0 : index
    %c0_10 = arith.constant 0 : index
    %c0_11 = arith.constant 0 : index
    %9 = vector.load %arg13[%c0_9, %c0_10, %c0_11] : memref<1x1x32xf32, #tpu.memory_space<vmem>>, vector<1x1x32xf32>
    %10 = vector.shape_cast %9 : vector<1x1x32xf32> to vector<1x32xf32>
    %c0_12 = arith.constant 0 : index
    %c0_13 = arith.constant 0 : index
    %c0_14 = arith.constant 0 : index
    %11 = vector.load %arg14[%c0_12, %c0_13, %c0_14] : memref<1x1x32xf32, #tpu.memory_space<vmem>>, vector<1x1x32xf32>
    %12 = vector.shape_cast %11 : vector<1x1x32xf32> to vector<1x32xf32>
    %cst = arith.constant dense<0.000000e+00> : vector<16xf32>
    %13 = vector.multi_reduction <add>, %4, %cst [1] : vector<16x32xf32> to vector<16xf32>
    %14 = vector.shape_cast %13 : vector<16xf32> to vector<16x1xf32>
    %cst_15 = arith.constant 3.200000e+01 : f32
    %15 = vector.broadcast %cst_15 : f32 to vector<16x1xf32>
    %16 = arith.divf %14, %15 : vector<16x1xf32>
    %17 = vector.broadcast %16 : vector<16x1xf32> to vector<16x32xf32>
    %18 = arith.subf %4, %17 : vector<16x32xf32>
    %19 = arith.mulf %18, %18 : vector<16x32xf32>
    %cst_16 = arith.constant dense<0.000000e+00> : vector<16xf32>
    %20 = vector.multi_reduction <add>, %19, %cst_16 [1] : vector<16x32xf32> to vector<16xf32>
    %21 = vector.shape_cast %20 : vector<16xf32> to vector<16x1xf32>
    %cst_17 = arith.constant 3.200000e+01 : f32
    %22 = vector.broadcast %cst_17 : f32 to vector<16x1xf32>
    %23 = arith.divf %21, %22 : vector<16x1xf32>
    %24 = vector.broadcast %16 : vector<16x1xf32> to vector<16x32xf32>
    %25 = arith.subf %4, %24 : vector<16x32xf32>
    %cst_18 = arith.constant 9.99999974E-6 : f32
    %26 = vector.broadcast %cst_18 : f32 to vector<16x1xf32>
    %27 = arith.addf %23, %26 : vector<16x1xf32>
    %28 = math.rsqrt %27 : vector<16x1xf32>
    %29 = vector.broadcast %28 : vector<16x1xf32> to vector<16x32xf32>
    %30 = arith.mulf %25, %29 : vector<16x32xf32>
    %31 = vector.broadcast %6 : vector<1x32xf32> to vector<16x32xf32>
    %32 = arith.mulf %30, %31 : vector<16x32xf32>
    %33 = vector.broadcast %8 : vector<1x32xf32> to vector<16x32xf32>
    %34 = arith.addf %32, %33 : vector<16x32xf32>
    %c0_19 = arith.constant 0 : index
    %c0_20 = arith.constant 0 : index
    %c0_21 = arith.constant 0 : index
    %35 = vector.load %arg3[%c0_19, %c0_20, %c0_21] : memref<1x32x96xf32, #tpu.memory_space<vmem>>, vector<1x32x96xf32>
    %36 = vector.shape_cast %35 : vector<1x32x96xf32> to vector<32x96xf32>
    %cst_22 = arith.constant dense<0.000000e+00> : vector<16x96xf32>
    %37 = tpu.matmul %34, %36, %cst_22 {dimension_numbers = #tpu.dot_dimension_numbers<[1], [0], [0], [1], [0, 0, 1, 1], [], []>} : vector<16x32xf32>, vector<32x96xf32>, vector<16x96xf32> -> vector<16x96xf32>
    %c0_23 = arith.constant 0 : index
    %c0_24 = arith.constant 0 : index
    %c0_25 = arith.constant 0 : index
    %38 = vector.load %arg4[%c0_23, %c0_24, %c0_25] : memref<1x1x96xf32, #tpu.memory_space<vmem>>, vector<1x1x96xf32>
    %39 = vector.shape_cast %38 : vector<1x1x96xf32> to vector<1x96xf32>
    %40 = vector.broadcast %39 : vector<1x96xf32> to vector<16x96xf32>
    %41 = arith.addf %37, %40 : vector<16x96xf32>
    %42 = vector.extract_strided_slice %41 {offsets = [0, 0], sizes = [16, 32], strides = [1, 1]} : vector<16x96xf32> to vector<16x32xf32>
    %43 = vector.shape_cast %42 : vector<16x32xf32> to vector<16x4x8xf32>
    %44 = tpu.transpose %43, [1, 0, 2] : vector<16x4x8xf32> -> vector<4x16x8xf32>
    %45 = vector.shape_cast %44 : vector<4x16x8xf32> to vector<8x8x8xf32>
    %46 = vector.extract_strided_slice %41 {offsets = [0, 32], sizes = [16, 32], strides = [1, 1]} : vector<16x96xf32> to vector<16x32xf32>
    %47 = vector.shape_cast %46 : vector<16x32xf32> to vector<16x4x8xf32>
    %48 = tpu.transpose %47, [1, 0, 2] : vector<16x4x8xf32> -> vector<4x16x8xf32>
    %49 = vector.shape_cast %48 : vector<4x16x8xf32> to vector<8x8x8xf32>
    %50 = vector.extract_strided_slice %41 {offsets = [0, 64], sizes = [16, 32], strides = [1, 1]} : vector<16x96xf32> to vector<16x32xf32>
    %51 = vector.shape_cast %50 : vector<16x32xf32> to vector<16x4x8xf32>
    %52 = tpu.transpose %51, [1, 0, 2] : vector<16x4x8xf32> -> vector<4x16x8xf32>
    %53 = vector.shape_cast %52 : vector<4x16x8xf32> to vector<8x8x8xf32>
    %cst_26 = arith.constant -3.40282347E+38 : f32
    %54 = vector.broadcast %cst_26 : f32 to vector<8x8x1xf32>
    %cst_27 = arith.constant 0.000000e+00 : f32
    %55 = vector.broadcast %cst_27 : f32 to vector<8x8x1xf32>
    %cst_28 = arith.constant 0.000000e+00 : f32
    %56 = vector.broadcast %cst_28 : f32 to vector<8x8x8xf32>
    "tpu.trace_start"() <{level = 10 : i32, message = "nsd,ntd->nst"}> : () -> ()
    %cst_29 = arith.constant dense<0.000000e+00> : vector<8x8x8xf32>
    %57 = tpu.matmul %45, %49, %cst_29 {dimension_numbers = #tpu.dot_dimension_numbers<[2], [2], [1], [1], [0, 0, 0, 1, 1, 1], [0], [0]>} : vector<8x8x8xf32>, vector<8x8x8xf32>, vector<8x8x8xf32> -> vector<8x8x8xf32>
    "tpu.trace_stop"() : () -> ()
    %cst_30 = arith.constant dense<0xFF800000> : vector<8x8xf32>
    %58 = vector.multi_reduction <maximumf>, %57, %cst_30 [2] : vector<8x8x8xf32> to vector<8x8xf32>
    %59 = vector.shape_cast %58 : vector<8x8xf32> to vector<8x8x1xf32>
    %60 = arith.maximumf %54, %59 : vector<8x8x1xf32>
    %61 = arith.subf %54, %60 : vector<8x8x1xf32>
    %62 = math.exp %61 : vector<8x8x1xf32>
    %63 = vector.broadcast %60 : vector<8x8x1xf32> to vector<8x8x8xf32>
    %64 = arith.subf %57, %63 : vector<8x8x8xf32>
    %65 = math.exp %64 : vector<8x8x8xf32>
    %66 = arith.mulf %62, %55 : vector<8x8x1xf32>
    %cst_31 = arith.constant dense<0.000000e+00> : vector<8x8xf32>
    %67 = vector.multi_reduction <add>, %65, %cst_31 [2] : vector<8x8x8xf32> to vector<8x8xf32>
    %68 = vector.shape_cast %67 : vector<8x8xf32> to vector<8x8x1xf32>
    %69 = arith.addf %66, %68 : vector<8x8x1xf32>
    %70 = vector.broadcast %62 : vector<8x8x1xf32> to vector<8x8x8xf32>
    %71 = arith.mulf %70, %56 : vector<8x8x8xf32>
    "tpu.trace_start"() <{level = 10 : i32, message = "nst,ntd->nsd"}> : () -> ()
    %cst_32 = arith.constant dense<0.000000e+00> : vector<8x8x8xf32>
    %72 = tpu.matmul %65, %53, %cst_32 {dimension_numbers = #tpu.dot_dimension_numbers<[2], [1], [1], [2], [0, 0, 0, 1, 1, 2], [0], [0]>} : vector<8x8x8xf32>, vector<8x8x8xf32>, vector<8x8x8xf32> -> vector<8x8x8xf32>
    "tpu.trace_stop"() : () -> ()
    %73 = arith.addf %71, %72 : vector<8x8x8xf32>
    %74 = tpu.reciprocal %69 : vector<8x8x1xf32> -> vector<8x8x1xf32>
    %75 = vector.broadcast %74 : vector<8x8x1xf32> to vector<8x8x8xf32>
    %76 = arith.mulf %73, %75 : vector<8x8x8xf32>
    %77 = vector.shape_cast %76 : vector<8x8x8xf32> to vector<4x16x8xf32>
    %78 = tpu.transpose %77, [1, 0, 2] : vector<4x16x8xf32> -> vector<16x4x8xf32>
    %79 = vector.shape_cast %78 : vector<16x4x8xf32> to vector<16x32xf32>
    %c0_33 = arith.constant 0 : index
    %c0_34 = arith.constant 0 : index
    %c0_35 = arith.constant 0 : index
    %80 = vector.load %arg5[%c0_33, %c0_34, %c0_35] : memref<1x32x32xf32, #tpu.memory_space<vmem>>, vector<1x32x32xf32>
    %81 = vector.shape_cast %80 : vector<1x32x32xf32> to vector<32x32xf32>
    %cst_36 = arith.constant dense<0.000000e+00> : vector<16x32xf32>
    %82 = tpu.matmul %79, %81, %cst_36 {dimension_numbers = #tpu.dot_dimension_numbers<[1], [0], [0], [1], [0, 0, 1, 1], [], []>} : vector<16x32xf32>, vector<32x32xf32>, vector<16x32xf32> -> vector<16x32xf32>
    %c0_37 = arith.constant 0 : index
    %c0_38 = arith.constant 0 : index
    %c0_39 = arith.constant 0 : index
    %83 = vector.load %arg6[%c0_37, %c0_38, %c0_39] : memref<1x1x32xf32, #tpu.memory_space<vmem>>, vector<1x1x32xf32>
    %84 = vector.shape_cast %83 : vector<1x1x32xf32> to vector<1x32xf32>
    %85 = vector.broadcast %84 : vector<1x32xf32> to vector<16x32xf32>
    %86 = arith.addf %82, %85 : vector<16x32xf32>
    %87 = arith.addf %4, %86 : vector<16x32xf32>
    %cst_40 = arith.constant dense<0.000000e+00> : vector<16xf32>
    %88 = vector.multi_reduction <add>, %87, %cst_40 [1] : vector<16x32xf32> to vector<16xf32>
    %89 = vector.shape_cast %88 : vector<16xf32> to vector<16x1xf32>
    %cst_41 = arith.constant 3.200000e+01 : f32
    %90 = vector.broadcast %cst_41 : f32 to vector<16x1xf32>
    %91 = arith.divf %89, %90 : vector<16x1xf32>
    %92 = vector.broadcast %91 : vector<16x1xf32> to vector<16x32xf32>
    %93 = arith.subf %87, %92 : vector<16x32xf32>
    %94 = arith.mulf %93, %93 : vector<16x32xf32>
    %cst_42 = arith.constant dense<0.000000e+00> : vector<16xf32>
    %95 = vector.multi_reduction <add>, %94, %cst_42 [1] : vector<16x32xf32> to vector<16xf32>
    %96 = vector.shape_cast %95 : vector<16xf32> to vector<16x1xf32>
    %cst_43 = arith.constant 3.200000e+01 : f32
    %97 = vector.broadcast %cst_43 : f32 to vector<16x1xf32>
    %98 = arith.divf %96, %97 : vector<16x1xf32>
    %99 = vector.broadcast %91 : vector<16x1xf32> to vector<16x32xf32>
    %100 = arith.subf %87, %99 : vector<16x32xf32>
    %cst_44 = arith.constant 9.99999974E-6 : f32
    %101 = vector.broadcast %cst_44 : f32 to vector<16x1xf32>
    %102 = arith.addf %98, %101 : vector<16x1xf32>
    %103 = math.rsqrt %102 : vector<16x1xf32>
    %104 = vector.broadcast %103 : vector<16x1xf32> to vector<16x32xf32>
    %105 = arith.mulf %100, %104 : vector<16x32xf32>
    %106 = vector.broadcast %10 : vector<1x32xf32> to vector<16x32xf32>
    %107 = arith.mulf %105, %106 : vector<16x32xf32>
    %108 = vector.broadcast %12 : vector<1x32xf32> to vector<16x32xf32>
    %109 = arith.addf %107, %108 : vector<16x32xf32>
    %c0_45 = arith.constant 0 : index
    %c0_46 = arith.constant 0 : index
    %c0_47 = arith.constant 0 : index
    %110 = vector.load %arg9[%c0_45, %c0_46, %c0_47] : memref<1x32x64xf32, #tpu.memory_space<vmem>>, vector<1x32x64xf32>
    %111 = vector.shape_cast %110 : vector<1x32x64xf32> to vector<32x64xf32>
    %cst_48 = arith.constant dense<0.000000e+00> : vector<16x64xf32>
    %112 = tpu.matmul %109, %111, %cst_48 {dimension_numbers = #tpu.dot_dimension_numbers<[1], [0], [0], [1], [0, 0, 1, 1], [], []>} : vector<16x32xf32>, vector<32x64xf32>, vector<16x64xf32> -> vector<16x64xf32>
    %c0_49 = arith.constant 0 : index
    %c0_50 = arith.constant 0 : index
    %c0_51 = arith.constant 0 : index
    %113 = vector.load %arg10[%c0_49, %c0_50, %c0_51] : memref<1x1x64xf32, #tpu.memory_space<vmem>>, vector<1x1x64xf32>
    %114 = vector.shape_cast %113 : vector<1x1x64xf32> to vector<1x64xf32>
    %115 = vector.broadcast %114 : vector<1x64xf32> to vector<16x64xf32>
    %116 = arith.addf %112, %115 : vector<16x64xf32>
    %cst_52 = arith.constant 0.000000e+00 : f32
    %117 = vector.broadcast %cst_52 : f32 to vector<16x64xf32>
    %118 = arith.maximumf %116, %117 : vector<16x64xf32>
    %c0_53 = arith.constant 0 : index
    %c0_54 = arith.constant 0 : index
    %c0_55 = arith.constant 0 : index
    %119 = vector.load %arg11[%c0_53, %c0_54, %c0_55] : memref<1x64x32xf32, #tpu.memory_space<vmem>>, vector<1x64x32xf32>
    %120 = vector.shape_cast %119 : vector<1x64x32xf32> to vector<64x32xf32>
    %cst_56 = arith.constant dense<0.000000e+00> : vector<16x32xf32>
    %121 = tpu.matmul %118, %120, %cst_56 {dimension_numbers = #tpu.dot_dimension_numbers<[1], [0], [0], [1], [0, 0, 1, 1], [], []>} : vector<16x64xf32>, vector<64x32xf32>, vector<16x32xf32> -> vector<16x32xf32>
    %c0_57 = arith.constant 0 : index
    %c0_58 = arith.constant 0 : index
    %c0_59 = arith.constant 0 : index
    %122 = vector.load %arg12[%c0_57, %c0_58, %c0_59] : memref<1x1x32xf32, #tpu.memory_space<vmem>>, vector<1x1x32xf32>
    %123 = vector.shape_cast %122 : vector<1x1x32xf32> to vector<1x32xf32>
    %124 = vector.broadcast %123 : vector<1x32xf32> to vector<16x32xf32>
    %125 = arith.addf %121, %124 : vector<16x32xf32>
    %126 = arith.addf %87, %125 : vector<16x32xf32>
    %127 = vector.shape_cast %126 : vector<16x32xf32> to vector<2x8x32xf32>
    %c0_60 = arith.constant 0 : index
    %c0_61 = arith.constant 0 : index
    %c0_62 = arith.constant 0 : index
    %128 = vector.load %arg17[%c0_60, %c0_61, %c0_62] : memref<2x8x32xf32, #tpu.memory_space<vmem>>, vector<2x8x32xf32>
    tpu.vector_store %arg17[%c0_60, %c0_61, %c0_62], %127 {strides = array<i32>} : memref<2x8x32xf32, #tpu.memory_space<vmem>>, vector<2x8x32xf32>,
    %c1_i32 = arith.constant 1 : i32
    %129 = arith.cmpi eq, %arg1, %c1_i32 : i32
    %130 = arith.extui %129 : i1 to i32
    %c0_i32_63 = arith.constant 0 : i32
    %131 = arith.cmpi ne, %130, %c0_i32_63 : i32
    scf.if %131 {
      %c0_64 = arith.constant 0 : index
      %c0_65 = arith.constant 0 : index
      %132 = vector.load %arg15[%c0_64, %c0_65] : memref<1x32xf32, #tpu.memory_space<vmem>>, vector<1x32xf32>
      %c0_66 = arith.constant 0 : index
      %c0_67 = arith.constant 0 : index
      %133 = vector.load %arg16[%c0_66, %c0_67] : memref<1x32xf32, #tpu.memory_space<vmem>>, vector<1x32xf32>
      %cst_68 = arith.constant dense<0.000000e+00> : vector<16xf32>
      %134 = vector.multi_reduction <add>, %126, %cst_68 [1] : vector<16x32xf32> to vector<16xf32>
      %135 = vector.shape_cast %134 : vector<16xf32> to vector<16x1xf32>
      %cst_69 = arith.constant 3.200000e+01 : f32
      %136 = vector.broadcast %cst_69 : f32 to vector<16x1xf32>
      %137 = arith.divf %135, %136 : vector<16x1xf32>
      %138 = vector.broadcast %137 : vector<16x1xf32> to vector<16x32xf32>
      %139 = arith.subf %126, %138 : vector<16x32xf32>
      %140 = arith.mulf %139, %139 : vector<16x32xf32>
      %cst_70 = arith.constant dense<0.000000e+00> : vector<16xf32>
      %141 = vector.multi_reduction <add>, %140, %cst_70 [1] : vector<16x32xf32> to vector<16xf32>
      %142 = vector.shape_cast %141 : vector<16xf32> to vector<16x1xf32>
      %cst_71 = arith.constant 3.200000e+01 : f32
      %143 = vector.broadcast %cst_71 : f32 to vector<16x1xf32>
      %144 = arith.divf %142, %143 : vector<16x1xf32>
      %145 = vector.broadcast %137 : vector<16x1xf32> to vector<16x32xf32>
      %146 = arith.subf %126, %145 : vector<16x32xf32>
      %cst_72 = arith.constant 9.99999974E-6 : f32
      %147 = vector.broadcast %cst_72 : f32 to vector<16x1xf32>
      %148 = arith.addf %144, %147 : vector<16x1xf32>
      %149 = math.rsqrt %148 : vector<16x1xf32>
      %150 = vector.broadcast %149 : vector<16x1xf32> to vector<16x32xf32>
      %151 = arith.mulf %146, %150 : vector<16x32xf32>
      %152 = vector.broadcast %132 : vector<1x32xf32> to vector<16x32xf32>
      %153 = arith.mulf %151, %152 : vector<16x32xf32>
      %154 = vector.broadcast %133 : vector<1x32xf32> to vector<16x32xf32>
      %155 = arith.addf %153, %154 : vector<16x32xf32>
      %156 = vector.shape_cast %155 : vector<16x32xf32> to vector<2x8x32xf32>
      %c0_73 = arith.constant 0 : index
      %c0_74 = arith.constant 0 : index
      %c0_75 = arith.constant 0 : index
      %157 = vector.load %arg17[%c0_73, %c0_74, %c0_75] : memref<2x8x32xf32, #tpu.memory_space<vmem>>, vector<2x8x32xf32>
      tpu.vector_store %arg17[%c0_73, %c0_74, %c0_75], %156 {strides = array<i32>} : memref<2x8x32xf32, #tpu.memory_space<vmem>>, vector<2x8x32xf32>,
    } else {
    }
    return
  }
  func.func @transform_0(%arg0: i32, %arg1: i32) -> (i32, i32, i32) {
    %c0_i32 = arith.constant 0 : i32
    %c0_i32_0 = arith.constant 0 : i32
    %c0_i32_1 = arith.constant 0 : i32
    return %arg0, %c0_i32, %c0_i32_0 : i32, i32, i32
  }
  func.func @transform_1(%arg0: i32, %arg1: i32) -> (i32, i32, i32) {
    %c0_i32 = arith.constant 0 : i32
    %c0_i32_0 = arith.constant 0 : i32
    %c0_i32_1 = arith.constant 0 : i32
    return %arg1, %c0_i32, %c0_i32_0 : i32, i32, i32
  }
  func.func @transform_2(%arg0: i32, %arg1: i32) -> (i32, i32, i32) {
    %c0_i32 = arith.constant 0 : i32
    %c0_i32_0 = arith.constant 0 : i32
    %c0_i32_1 = arith.constant 0 : i32
    return %arg1, %c0_i32, %c0_i32_0 : i32, i32, i32
  }
  func.func @transform_3(%arg0: i32, %arg1: i32) -> (i32, i32, i32) {
    %c0_i32 = arith.constant 0 : i32
    %c0_i32_0 = arith.constant 0 : i32
    %c0_i32_1 = arith.constant 0 : i32
    return %arg1, %c0_i32, %c0_i32_0 : i32, i32, i32
  }
  func.func @transform_4(%arg0: i32, %arg1: i32) -> (i32, i32, i32) {
    %c0_i32 = arith.constant 0 : i32
    %c0_i32_0 = arith.constant 0 : i32
    %c0_i32_1 = arith.constant 0 : i32
    return %arg1, %c0_i32, %c0_i32_0 : i32, i32, i32
  }
  func.func @transform_5(%arg0: i32, %arg1: i32) -> (i32, i32, i32) {
    %c0_i32 = arith.constant 0 : i32
    %c0_i32_0 = arith.constant 0 : i32
    %c0_i32_1 = arith.constant 0 : i32
    return %arg1, %c0_i32, %c0_i32_0 : i32, i32, i32
  }
  func.func @transform_6(%arg0: i32, %arg1: i32) -> (i32, i32, i32) {
    %c0_i32 = arith.constant 0 : i32
    %c0_i32_0 = arith.constant 0 : i32
    %c0_i32_1 = arith.constant 0 : i32
    return %arg1, %c0_i32, %c0_i32_0 : i32, i32, i32
  }
  func.func @transform_7(%arg0: i32, %arg1: i32) -> (i32, i32, i32) {
    %c0_i32 = arith.constant 0 : i32
    %c0_i32_0 = arith.constant 0 : i32
    %c0_i32_1 = arith.constant 0 : i32
    return %arg1, %c0_i32, %c0_i32_0 : i32, i32, i32
  }
  func.func @transform_8(%arg0: i32, %arg1: i32) -> (i32, i32, i32) {
    %c0_i32 = arith.constant 0 : i32
    %c0_i32_0 = arith.constant 0 : i32
    %c0_i32_1 = arith.constant 0 : i32
    return %arg1, %c0_i32, %c0_i32_0 : i32, i32, i32
  }
  func.func @transform_9(%arg0: i32, %arg1: i32) -> (i32, i32, i32) {
    %c0_i32 = arith.constant 0 : i32
    %c0_i32_0 = arith.constant 0 : i32
    %c0_i32_1 = arith.constant 0 : i32
    return %arg1, %c0_i32, %c0_i32_0 : i32, i32, i32
  }
  func.func @transform_10(%arg0: i32, %arg1: i32) -> (i32, i32, i32) {
    %c0_i32 = arith.constant 0 : i32
    %c0_i32_0 = arith.constant 0 : i32
    %c0_i32_1 = arith.constant 0 : i32
    return %arg1, %c0_i32, %c0_i32_0 : i32, i32, i32
  }
  func.func @transform_11(%arg0: i32, %arg1: i32) -> (i32, i32, i32) {
    %c0_i32 = arith.constant 0 : i32
    %c0_i32_0 = arith.constant 0 : i32
    %c0_i32_1 = arith.constant 0 : i32
    return %arg1, %c0_i32, %c0_i32_0 : i32, i32, i32
  }
  func.func @transform_12(%arg0: i32, %arg1: i32) -> (i32, i32, i32) {
    %c0_i32 = arith.constant 0 : i32
    %c0_i32_0 = arith.constant 0 : i32
    %c0_i32_1 = arith.constant 0 : i32
    return %arg1, %c0_i32, %c0_i32_0 : i32, i32, i32
  }
  func.func @transform_13(%arg0: i32, %arg1: i32) -> (i32, i32) {
    %c0_i32 = arith.constant 0 : i32
    %c0_i32_0 = arith.constant 0 : i32
    %c0_i32_1 = arith.constant 0 : i32
    return %c0_i32, %c0_i32_0 : i32, i32
  }
  func.func @transform_14(%arg0: i32, %arg1: i32) -> (i32, i32) {
    %c0_i32 = arith.constant 0 : i32
    %c0_i32_0 = arith.constant 0 : i32
    %c0_i32_1 = arith.constant 0 : i32
    return %c0_i32, %c0_i32_0 : i32, i32
  }
  func.func @transform_15(%arg0: i32, %arg1: i32) -> (i32, i32, i32) {
    %c0_i32 = arith.constant 0 : i32
    %c0_i32_0 = arith.constant 0 : i32
    %c0_i32_1 = arith.constant 0 : i32
    return %arg0, %c0_i32, %c0_i32_0 : i32, i32, i32
  }
}

</mosaic_0001>

<bundles_post_ra>
// kernel: transformer_encoder_forward.1
= control target key start
LH: loop header
LB: loop body
LE: loop exit
PB: predicated region body
PF: predicated region fallthrough
CT: control target
= control target key end

     0   :  { %s3162_s18 = smov 0   ;;  %s3164_s19 = smov 0   ;;  %s4164_s0 = inlined_call_operand.vmem [shape: f32[2,8,32], index: 0, kind: input, shape index: {}, may-alias: {0,15}]   ;;  %s4165_s1 = inlined_call_operand.vmem [shape: f32[2,32,96], index: 1, kind: input, shape index: {}]   ;;  %s4166_s2 = inlined_call_operand.vmem [shape: f32[2,1,96], index: 2, kind: input, shape index: {}]   ;;  %s4167_s3 = inlined_call_operand.vmem [shape: f32[2,32,32], index: 3, kind: input, shape index: {}]   ;;  %s4168_s4 = inlined_call_operand.vmem [shape: f32[2,1,32], index: 4, kind: input, shape index: {}]   ;;  %s4169_s5 = inlined_call_operand.vmem [shape: f32[2,1,32], index: 5, kind: input, shape index: {}]   ;;  %s4170_s6 = inlined_call_operand.vmem [shape: f32[2,1,32], index: 6, kind: input, shape index: {}]   ;;  %s4171_s7 = inlined_call_operand.vmem [shape: f32[2,32,64], index: 7, kind: input, shape index: {}]   ;;  %s4172_s8 = inlined_call_operand.vmem [shape: f32[2,1,64], index: 8, kind: input, shape index: {}]   ;;  %s4173_s9 = inlined_call_operand.vmem [shape: f32[2,64,32], index: 9, kind: input, shape index: {}]   ;;  %s4174_s10 = inlined_call_operand.vmem [shape: f32[2,1,32], index: 10, kind: input, shape index: {}]   ;;  %s4175_s11 = inlined_call_operand.vmem [shape: f32[2,1,32], index: 11, kind: input, shape index: {}]   ;;  %s4176_s12 = inlined_call_operand.vmem [shape: f32[2,1,32], index: 12, kind: input, shape index: {}]   ;;  %s4177_s13 = inlined_call_operand.vmem [shape: f32[1,32], index: 13, kind: input, shape index: {}]   ;;  %s4178_s14 = inlined_call_operand.vmem [shape: f32[1,32], index: 14, kind: input, shape index: {}]   ;;  %s4179_s15 = inlined_call_operand.vmem [shape: f32[2,8,32], index: 15, kind: output, shape index: {}, may-alias: {0,15}]  }
   0x1   :  { %4186 = sst [smem:[#allocation6_spill]] %s4165_s1  ;;  %s3166_s20 = smov 0  }
   0x2   :  { %4187 = sst [smem:[#allocation7_spill]] %s4167_s3 }
   0x3   :  { %4188 = sst [smem:[#allocation8_spill]] %s4177_s13 }
   0x4   :  { %4189 = sst [smem:[#allocation9_spill]] %s4178_s14 }
   0x5   :  { %4190 = sst [smem:[#allocation10_spill]] %s4179_s15 }
   0x6 LB: > { %4191 = sst [smem:[#allocation2_spill]] %s3065_s19  ;;  %s34_s21 = sadd.s32 1, %s3065_s19  ;;  %s3069_s20 = sphi %s3166_s20, %s25_s20   ;;  %s3065_s19 = sphi %s3164_s19, %s4226_s19   ;;  %s3061_s18 = sphi %s3162_s18, %s4225_s18  }
   0x7   : > { %4192 = sst [smem:[#allocation3_spill]] %s3069_s20  ;;  %p2867_p0 = scmp.ge.s32.totalorder %s3069_s20, 1 }
   0x8   : > { %p35_p1 = scmp.ge.s32.totalorder %s34_s21, 2  ;;  %p554_p2 = scmp.lt.s32.totalorder %s3069_s20, 3 }
   0xa   : > { %s4228_s21 = smov (%p35_p1, %s34_s21), 0  ;;  %p555_p3 = pnand %p2867_p0, %p554_p2 }
   0xb   : > { %4193 = sst [smem:[#allocation4_spill]] %s4228_s21 }
   0xc   : > { %558 = sbr.rel (%p555_p3) target bundleno = 2235 (0x8bb), region = 80 }
  0x11   : > { %p652_p4 = scmp.lt.s32.totalorder %s3061_s18, 1  ;;  %s4194_s1 = sld [smem:[#allocation6_spill]] }
  0x12   : > { %s4195_s3 = sld [smem:[#allocation7_spill]]  ;;  %p2876_p5 = scmp.ne.s32.totalorder %s3061_s18, 0 }
  0x13   : > { %s3184_s22 = scalar_select %p652_p4, %s3061_s18, 1 }
  0x14   : > { %s4197_s26 = sld [smem:[#allocation10_spill]] (!%p2876_p5) }
  0x15   : > { %s2914_s23 = sshll.u32 %s3184_s22, 5  ;;  %s692_s27 = scalar_lea.vmem %s4175_s11, %s3184_s22 }
  0x16   : > { %s695_s15 = scalar_lea.vmem %s4176_s12, %s3184_s22  ;;  %705 = sbr.rel (%p2876_p5) target bundleno = 30 (0x1e), region = 84 }
  0x17   : > { %s3194_s29 = scalar_lea.vmem %s4194_s1, %s2914_s23  ;;  %s3216_s1 = scalar_lea.vmem %s4171_s7, %s2914_s23 }
  0x18   : > { %s3199_s17 = scalar_lea.vmem %s4195_s3, %s2914_s23  ;;  %s681_s3 = scalar_lea.vmem %s4172_s8, %s3184_s22 }
  0x19   : > { %4196 = sst [smem:[#allocation5_spill]] %s3199_s17  ;;  %s2917_s17 = sshll.u32 %s3184_s22, 6 }
  0x1a   : > { %s3226_s20 = scalar_lea.vmem %s4173_s9, %s2917_s17 }
  0x1b   : > { %v706_v0 = vld [vmem:[%s4164_s0] sm:$0xff]  ;;  %vm708_vm0 = vcmask 261120   ;;  %v707_v1 = vld [vmem:[%s4164_s0 + $0x8] sm:$0xff] }
  0x1c   : > { %709 = vst.msk [vmem:[%s4197_s26] sm:$0xff] %vm708_vm0, %v706_v0 }
  0x1d   : > { %710 = vst.msk [vmem:[%s4197_s26 + $0x8] sm:$0xff] %vm708_vm0, %v707_v1 }
  0x1e PF: > { %s4198_s24 = sld [smem:[#allocation10_spill]]  ;;  %vm717_vm1 = vcmask 261120   ;;  %v3071_v6 = vmov 32.0   ;;  %v782_v23 = vld [vmem:[%s3194_s29 + $0x18] sm:$0xff]  ;;  %v781_v24 = vld [vmem:[%s3194_s29 + $0x10] sm:$0xff]  ;;  %v780_v25 = vld [vmem:[%s3194_s29 + $0x8] sm:$0xff]  ;;  %s4199_s19 = scalar_lea.vmem %s4169_s5, %s3184_s22 }
  0x1f   : > { %2981 = vrcp.f32 %v3071_v6  ;;  %805 = vmatpush.msra.mxu0 %v782_v23  ;;  %v779_v26 = vld [vmem:[%s3194_s29] sm:$0xff]  ;;  %s4200_s26 = scalar_lea.vmem %s4170_s6, %s3184_s22  ;;  %s4201_s23 = scalar_lea.vmem %s4166_s2, %s3184_s22  ;;  %v3076_v62 = vmov 1983009808   ;;  %vm837_vm9 = vcmask 1047556   ;;  %vm1545_vm10 = vcmask 64512  }
  0x20   : > { %v2973_v41 = vld [vmem:[%s4199_s19] ss:$0 sm:$0xff]  ;;  %s3072_s28 = smov 104   ;;  %s3073_s30 = smov 120   ;;  %v842_v63 = vunpack.c.l.s4 %v3076_v62 }
  0x21   : > { %806 = vmatpush.msra.mxu0 %v781_v24  ;;  %v2974_v45 = vld [vmem:[%s4200_s26] ss:$0 sm:$0xff]  ;;  %s3074_s16 = smov 112   ;;  %s3075_s29 = smov 96  }
  0x22   : > { %v2975_v55 = vld [vmem:[%s4201_s23] ss:$0 sm:$0xff]  ;;  %s3078_s17 = smov 64   ;;  %s3079_s19 = smov 24  }
  0x23   : > { %807 = vmatpush.msra.mxu0 %v780_v25  ;;  %s3080_s21 = smov 16   ;;  %s3081_s13 = smov 8  }
  0x24   : > { %v711_v2 = vld [vmem:[%s4198_s24] sm:$0xff]  ;;  %v712_v4 = vld [vmem:[%s4198_s24 + $0x8] sm:$0xff]  ;;  %s4218_s26 = sld [smem:[#allocation5_spill]]  ;;  %s4219_s23 = scalar_lea.vmem %s4168_s4, %s3184_s22 }
  0x25   : > { %v718_v3 = vsel %vm717_vm1, %v711_v2, 0.0  ;;  %v721_v5 = vsel %vm717_vm1, %v712_v4, 0.0  ;;  %v2982_v7 = vpop.eup %2981  ;;  %808 = vmatpush.msra.mxu0 %v779_v26  ;;  %p2909_p6 = scmp.ne.s32.totalorder %s3061_s18, 1 }
  0x26   : > { %719 = vadd.xlane.f32.xlu0 %v718_v3  ;;  %v725_v8 = vmul.f32 32.0, %v2982_v7  ;;  %vm729_vm2 = vweird.f32 %v2982_v7  ;;  %v3314_v3 = vunpack.c.0.s8 %v842_v63 }
  0x28   : > { %v726_v9 = vsub.f32 1.0, %v725_v8 }
  0x2a   : > { %v727_v10 = vmul.f32 %v2982_v7, %v726_v9 }
  0x2c   : > { %v728_v11 = vadd.f32 %v2982_v7, %v727_v10 }
  0x2e   : > { %722 = vadd.xlane.f32.xlu0 %v721_v5  ;;  %v3261_v12 = vsel %vm729_vm2, %v2982_v7, %v728_v11  ;;  %v3077_v7 = vmov 1934713408  }
  0x2f   : > { %v866_v8 = vunpack.c.l.s4 %v3077_v7 }
  0x99   : > { %v720_v13 = vpop.xlane.xlu0 %719 }
  0x9a   : > { %v731_v14 = vmul.f32 %v3261_v12, %v720_v13 }
  0x9c   : > { %v733_v15 = vsub.f32 %v711_v2, %v731_v14 }
  0x9e   : > { %v735_v16 = vmul.f32 %v733_v15, %v733_v15 }
  0xa0   : > { %v737_v17 = vsel %vm717_vm1, %v735_v16, 0.0 }
  0xa1   : > { %738 = vadd.xlane.f32.xlu1 %v737_v17  ;;  %v723_v18 = vpop.xlane.xlu0 %722 }
  0xa2   : > { %v732_v19 = vmul.f32 %v3261_v12, %v723_v18  ;;  %v3331_v18 = vunpack.c.0.s8 %v866_v8 }
  0xa4   : > { %v734_v20 = vsub.f32 %v712_v4, %v732_v19 }
  0xa6   : > { %v736_v21 = vmul.f32 %v734_v20, %v734_v20 }
  0xa8   : > { %v740_v22 = vsel %vm717_vm1, %v736_v21, 0.0 }
  0xa9   : > { %741 = vadd.xlane.f32.xlu1 %v740_v22 }
 0x114   : > { %v739_v27 = vpop.xlane.xlu1 %738 }
 0x115   : > { %v743_v28 = vmul.f32 %v739_v27, %v3261_v12 }
 0x117   : > { %v745_v29 = vadd.f32 1e-05, %v743_v28 }
 0x119   : > { %2983 = vrsqrt.f32 %v745_v29  ;;  %vm753_vm4 = vweird.f32 %v745_v29 }
 0x11c   : > { %v742_v30 = vpop.xlane.xlu1 %741 }
 0x11d   : > { %v744_v31 = vmul.f32 %v742_v30, %v3261_v12 }
 0x11f   : > { %v2984_v32 = vpop.eup %2983  ;;  %v746_v33 = vadd.f32 1e-05, %v744_v31 }
 0x120   : > { %v748_v34 = vmul.f32 %v2984_v32, %v745_v29  ;;  %vm754_vm3 = vweird.f32 %v2984_v32 }
 0x121   : > { %2985 = vrsqrt.f32 %v746_v33  ;;  %vm755_vm5 = vmor %vm753_vm4, %vm754_vm3  ;;  %vm763_vm6 = vweird.f32 %v746_v33 }
 0x122   : > { %v749_v35 = vmul.f32 %v2984_v32, %v748_v34 }
 0x124   : > { %v750_v36 = vmul.f32 0.5, %v749_v35 }
 0x126   : > { %v751_v37 = vsub.f32 1.5, %v750_v36 }
 0x127   : > { %v2986_v38 = vpop.eup %2985 }
 0x128   : > { %v752_v39 = vmul.f32 %v2984_v32, %v751_v37  ;;  %v758_v40 = vmul.f32 %v2986_v38, %v746_v33  ;;  %vm764_vm7 = vweird.f32 %v2986_v38 }
 0x129   : > { %vm765_vm8 = vmor %vm763_vm6, %vm764_vm7 }
 0x12a   : > { %v756_v42 = vsel %vm755_vm5, %v2984_v32, %v752_v39  ;;  %v759_v43 = vmul.f32 %v2986_v38, %v758_v40 }
 0x12b   : > { %v767_v44 = vmul.f32 %v756_v42, %v733_v15 }
 0x12c   : > { %v760_v46 = vmul.f32 0.5, %v759_v43 }
 0x12d   : > { %v772_v47 = vmul.f32 %v2973_v41, %v767_v44 }
 0x12e   : > { %v761_v48 = vsub.f32 1.5, %v760_v46 }
 0x12f   : > { %v777_v49 = vadd.f32 %v2974_v45, %v772_v47 }
 0x130   : > { %v762_v50 = vmul.f32 %v2986_v38, %v761_v48 }
 0x131   : > { %2877 = vmatmul.msk.f32.vlgmr.msra.gmra.mxu0 %vm717_vm1, %v777_v49 }
 0x132   : > { %v766_v51 = vsel %vm765_vm8, %v2986_v38, %v762_v50 }
 0x133   : > { %v768_v52 = vmul.f32 %v766_v51, %v734_v20 }
 0x135   : > { %v773_v53 = vmul.f32 %v2973_v41, %v768_v52 }
 0x137   : > { %v778_v54 = vadd.f32 %v2974_v45, %v773_v53 }
 0x139   : > { %2878 = vmatmul.msk.f32.gmra.mxu0 %vm717_vm1, %v778_v54 }
 0x1ae   : > { %v810_v56 = vpop.f32.mrf.mxu0 }
 0x1af   : > { %v3290_v57 = vadd.f32 %v2975_v55, %v810_v56 }
 0x1b1   : > { %830 = vrot.lane.b32.xlu0 %v3290_v57, %s3072_s28  ;;  %818 = vrot.lane.b32.xlu2 %v3290_v57, %s3073_s30  ;;  %v839_v2 = vrot.slane %v3290_v57, 4 }
 0x1b6   : > { %v813_v58 = vpop.f32.mrf.mxu0 }
 0x1b7   : > { %v3294_v59 = vadd.f32 %v2975_v55, %v813_v58 }
 0x1b9   : > { %824 = vrot.lane.b32.xlu2 %v3290_v57, %s3074_s16  ;;  %820 = vrot.lane.b32.xlu1 %v3294_v59, %s3073_s30  ;;  %v895_v10 = vrot.slane %v3294_v59, 4 }
 0x1c1   : > { %826 = vrot.lane.b32.xlu2 %v3294_v59, %s3074_s16  ;;  %s4222_s16 = sld [smem:[#allocation9_spill]] (!%p2909_p6) }
 0x1c9   : > { %832 = vrot.lane.b32.xlu2 %v3294_v59, %s3072_s28 }
 0x1d1   : > { %1057 = vrot.lane.b32.xlu2 %v3290_v57, %s3075_s29 }
 0x20b   : > { %v3302_v60 = vpop.permute.xlu2 %818 }
 0x20c   : > { %1061 = vrot.lane.b32.xlu0 %v3302_v60, %s3075_s29  ;;  %v851_v11 = vrot.slane %v3302_v60, 4  ;;  %v2953_v43 = vpack.i.bf16 %v3302_v60, %v3290_v57 }
 0x213   : > { %v3306_v61 = vpop.permute.xlu2 %824 }
 0x214   : > { %1059 = vrot.lane.b32.xlu0 %v3294_v59, %s3075_s29  ;;  %1065 = vrot.lane.b32.xlu2 %v3306_v61, %s3075_s29  ;;  %v836_v0 = vrot.slane %v3306_v61, 4  ;;  %v840_v4 = vsel %vm837_vm9, %v3306_v61, %v839_v2 }
 0x215   : > { %v848_v9 = vperm.slane %v840_v4, %v3314_v3 }
 0x216   : > { %v838_v5 = vsel %vm837_vm9, %v836_v0, %v3290_v57 }
 0x217   : > { %v844_v13 = vperm.slane %v838_v5, %v3314_v3  ;;  %v875_v21 = vrot.slane %v848_v9, 4 }
 0x219   : > { %v863_v23 = vrot.slane %v844_v13, 4 }
 0x21b   : > { %v827_v1 = vpop.permute.xlu2 %826 }
 0x21c   : > { %v893_v6 = vrot.slane %v827_v1, 4  ;;  %v896_v14 = vsel %vm837_vm9, %v827_v1, %v895_v10  ;;  %v2963_v34 = vpack.i.bf16 %v3294_v59, %v827_v1 }
 0x21d   : > { %v904_v24 = vperm.slane %v896_v14, %v3314_v3 }
 0x21e   : > { %v894_v17 = vsel %vm837_vm9, %v893_v6, %v3294_v59 }
 0x21f   : > { %v900_v26 = vperm.slane %v894_v17, %v3314_v3  ;;  %v931_v40 = vrot.slane %v904_v24, 4 }
 0x221   : > { %v919_v39 = vrot.slane %v900_v26, 4 }
 0x223   : > { %v3325_v15 = vpop.permute.xlu2 %832  ;;  %v3327_v16 = vpop.permute.xlu0 %830 }
 0x224   : > { %v849_v19 = vrot.slane %v3327_v16, 4  ;;  %v852_v20 = vsel %vm837_vm9, %v3327_v16, %v851_v11  ;;  %1071 = vrot.lane.b32.xlu0 %v3325_v15, %s3075_s29  ;;  %1069 = vrot.lane.b32.xlu1 %v3327_v16, %s3075_s29  ;;  %v905_v35 = vrot.slane %v3325_v15, 4  ;;  %v2958_v47 = vpack.i.bf16 %v3327_v16, %v3306_v61 }
 0x225   : > { %v860_v22 = vperm.slane %v852_v20, %v3314_v3 }
 0x226   : > { %v850_v25 = vsel %vm837_vm9, %v849_v19, %v3302_v60 }
 0x227   : > { %v856_v27 = vperm.slane %v850_v25, %v3314_v3  ;;  %v873_v28 = vrot.slane %v860_v22, 4  ;;  %v876_v29 = vsel %vm837_vm9, %v860_v22, %v875_v21 }
 0x228   : > { %v884_v30 = vperm.slane %v876_v29, %v3331_v18 }
 0x229   : > { %v861_v31 = vrot.slane %v856_v27, 4  ;;  %v864_v32 = vsel %vm837_vm9, %v856_v27, %v863_v23  ;;  %v874_v33 = vsel %vm837_vm9, %v873_v28, %v848_v9 }
 0x22a   : > { %v872_v36 = vperm.slane %v864_v32, %v3331_v18  ;;  %v880_v37 = vperm.slane %v874_v33, %v3331_v18  ;;  %v891_v38 = vrot.slane %v884_v30, 4 }
 0x22b   : > { %v862_v41 = vsel %vm837_vm9, %v861_v31, %v844_v13  ;;  %v3355_v42 = vpop.permute.xlu1 %820 }
 0x22c   : > { %v889_v44 = vrot.slane %v880_v37, 4  ;;  %v892_v45 = vsel %vm837_vm9, 0.0, %v891_v38  ;;  %v906_v46 = vsel %vm837_vm9, %v905_v35, %v3355_v42  ;;  %2964 = vrot.lane.b32.xlu0 %v2963_v34, %s3078_s17  ;;  %1063 = vrot.lane.b32.xlu2 %v3355_v42, %s3075_s29  ;;  %v907_v49 = vrot.slane %v3355_v42, 4 }
 0x22d   : > { %v965_v48 = vrot.slane %v892_v45, 4  ;;  %v912_v50 = vperm.slane %v906_v46, %v3314_v3  ;;  %1067 = vrot.lane.b32.xlu1 %v827_v1, %s3075_s29  ;;  %v2968_v51 = vpack.i.bf16 %v3355_v42, %v3325_v15  ;;  %v868_v53 = vperm.slane %v862_v41, %v3331_v18 }
 0x22e   : > { %v890_v52 = vsel %vm837_vm9, 0.0, %v889_v44  ;;  %v887_v54 = vrot.slane %v872_v36, 4  ;;  %v960_v55 = vsel %vm837_vm9, %v891_v38, %v880_v37  ;;  %v908_v56 = vsel %vm837_vm9, %v3325_v15, %v907_v49 }
 0x22f   : > { %v917_v57 = vrot.slane %v912_v50, 4  ;;  %v920_v58 = vsel %vm837_vm9, %v912_v50, %v919_v39  ;;  %v964_v59 = vperm.slane %v960_v55, %v3314_v3  ;;  %v916_v60 = vperm.slane %v908_v56, %v3314_v3 }
 0x230   : > { %v928_v61 = vperm.slane %v920_v58, %v3331_v18  ;;  %v885_v62 = vrot.slane %v868_v53, 4  ;;  %v888_v63 = vsel %vm837_vm9, 0.0, %v887_v54  ;;  %v949_v1 = vsel %vm837_vm9, %v887_v54, %v868_v53 }
 0x231   : > { %v918_v0 = vsel %vm837_vm9, %v917_v57, %v900_v26  ;;  %v954_v2 = vrot.slane %v888_v63, 4  ;;  %v966_v4 = vsel %vm837_vm9, %v965_v48, %v890_v52  ;;  %v929_v6 = vrot.slane %v916_v60, 4 }
 0x232   : > { %v924_v5 = vperm.slane %v918_v0, %v3331_v18  ;;  %v932_v7 = vsel %vm837_vm9, %v916_v60, %v931_v40  ;;  %v943_v8 = vrot.slane %v928_v61, 4  ;;  %v886_v10 = vsel %vm837_vm9, 0.0, %v885_v62 }
 0x233   : > { %v940_v9 = vperm.slane %v932_v7, %v3331_v18  ;;  %v953_v11 = vperm.slane %v949_v1, %v3314_v3  ;;  %v970_v13 = vperm.slane %v966_v4, %v3314_v3  ;;  %v930_v14 = vsel %vm837_vm9, %v929_v6, %v904_v24 }
 0x234   : > { %v941_v15 = vrot.slane %v924_v5, 4  ;;  %v944_v16 = vsel %vm837_vm9, 0.0, %v943_v8  ;;  %2954 = vrot.lane.b32.xlu2 %v2953_v43, %s3078_s17  ;;  %v955_v17 = vsel %vm837_vm9, %v954_v2, %v886_v10  ;;  %v936_v19 = vperm.slane %v930_v14, %v3331_v18  ;;  %v1058_v14 = vpop.permute.xlu2 %1057 }
 0x235   : > { %v947_v20 = vrot.slane %v940_v9, 4  ;;  %v1008_v21 = vrot.slane %v944_v16, 4  ;;  %2959 = vrot.lane.b32.xlu1 %v2958_v47, %s3078_s17  ;;  %v959_v22 = vperm.slane %v955_v17, %v3314_v3  ;;  %v973_v25 = vrot.slane %v953_v11, 4 }
 0x236   : > { %v942_v23 = vsel %vm837_vm9, 0.0, %v941_v15  ;;  %v983_v26 = vrot.slane %v970_v13, 4  ;;  %v985_v24 = vrot.slane %v964_v59, 4  ;;  %v945_v27 = vrot.slane %v936_v19, 4 }
 0x237   : > { %v948_v28 = vsel %vm837_vm9, 0.0, %v947_v20  ;;  %v971_v29 = vrot.slane %v959_v22, 4  ;;  %v1003_v30 = vsel %vm837_vm9, %v943_v8, %v924_v5  ;;  %v1009_v34 = vsel %vm837_vm9, %v1008_v21, %v942_v23 }
 0x238   : > { %v1019_v31 = vrot.slane %v948_v28, 4  ;;  %v984_v32 = vsel %vm837_vm9, %v983_v26, %v964_v59  ;;  %v1007_v33 = vperm.slane %v1003_v30, %v3314_v3  ;;  %v946_v37 = vsel %vm837_vm9, 0.0, %v945_v27 }
 0x239   : > { %v972_v35 = vsel %vm837_vm9, %v971_v29, %v953_v11  ;;  %v990_v36 = vperm.slane %v984_v32, %v3331_v18  ;;  %v1013_v38 = vperm.slane %v1009_v34, %v3314_v3  ;;  %v1014_v40 = vsel %vm837_vm9, %v947_v20, %v936_v19 }
 0x23a   : > { %v978_v39 = vperm.slane %v972_v35, %v3331_v18  ;;  %v1020_v41 = vsel %vm837_vm9, %v1019_v31, %v946_v37  ;;  %v1027_v42 = vrot.slane %v1007_v33, 4  ;;  %v1018_v44 = vperm.slane %v1014_v40, %v3314_v3 }
 0x23b   : > { %v995_v43 = vrot.slane %v990_v36, 4  ;;  %v1024_v45 = vperm.slane %v1020_v41, %v3314_v3  ;;  %v1025_v46 = vrot.slane %v1013_v38, 4  ;;  %v974_v49 = vsel %vm837_vm9, %v959_v22, %v973_v25 }
 0x23c   : > { %2969 = vrot.lane.b32.xlu2 %v2968_v51, %s3078_s17  ;;  %v997_v47 = vrot.slane %v978_v39, 4  ;;  %v1028_v48 = vsel %vm837_vm9, %v1013_v38, %v1027_v42  ;;  %v986_v50 = vsel %vm837_vm9, %v970_v13, %v985_v24  ;;  %v1039_v57 = vrot.slane %v1018_v44, 4  ;;  %s4223_s17 = sld [smem:[#allocation10_spill]] (!%p2909_p6) }
 0x23d   : > { %v3418_v52 = vsel %vm837_vm9, %v995_v43, %v978_v39  ;;  %v1026_v53 = vsel %vm837_vm9, %v1025_v46, %v1007_v33  ;;  %v1037_v54 = vrot.slane %v1024_v45, 4  ;;  %v1036_v55 = vperm.slane %v1028_v48, %v3331_v18 }
 0x23e   : > { %v3423_v56 = vsel %vm837_vm9, %v990_v36, %v997_v47  ;;  %v1032_v51 = vperm.slane %v1026_v53, %v3331_v18  ;;  %v982_v58 = vperm.slane %v974_v49, %v3331_v18  ;;  %v994_v61 = vperm.slane %v986_v50, %v3331_v18 }
 0x23f   : > { %v1038_v59 = vsel %vm837_vm9, %v1037_v54, %v1018_v44  ;;  %v1055_v60 = vrot.slane %v1036_v55, 4  ;;  %v1040_v63 = vsel %vm837_vm9, %v1024_v45, %v1039_v57  ;;  %v1083_v20 = vrot.slane %v1058_v14, 4 }
 0x240   : > { %v1044_v62 = vperm.slane %v1038_v59, %v3331_v18  ;;  %v1051_v0 = vrot.slane %v1032_v51, 4  ;;  %v1001_v1 = vrot.slane %v982_v58, 4  ;;  %v1048_v2 = vperm.slane %v1040_v63, %v3331_v18 }
 0x241   : > { %v999_v4 = vrot.slane %v994_v61, 4 }
 0x242   : > { %v1049_v5 = vrot.slane %v1044_v62, 4  ;;  %v3433_v6 = vsel %vm837_vm9, %v1044_v62, %v1051_v0  ;;  %v3436_v7 = vsel %vm837_vm9, %v994_v61, %v1001_v1  ;;  %v1053_v8 = vrot.slane %v1048_v2, 4 }
 0x243   : > { %v3439_v9 = vsel %vm837_vm9, %v999_v4, %v982_v58  ;;  %v3442_v10 = vsel %vm837_vm9, %v1048_v2, %v1055_v60 }
 0x244   : > { %v3445_v11 = vsel %vm837_vm9, %v1049_v5, %v1032_v51  ;;  %v3448_v13 = vsel %vm837_vm9, %v1053_v8, %v1036_v55 }
 0x26e   : > { %v1066_v15 = vpop.permute.xlu2 %1065 }
 0x26f   : > { %v1081_v19 = vrot.slane %v1066_v15, 4  ;;  %v1084_v21 = vsel %vm837_vm9, %v1066_v15, %v1083_v20 }
 0x270   : > { %v1092_v26 = vperm.slane %v1084_v21, %v3314_v3 }
 0x271   : > { %v1082_v23 = vsel %vm837_vm9, %v1081_v19, %v1058_v14 }
 0x272   : > { %v1088_v24 = vperm.slane %v1082_v23, %v3314_v3  ;;  %v1119_v27 = vrot.slane %v1092_v26, 4 }
 0x274   : > { %v1107_v29 = vrot.slane %v1088_v24, 4 }
 0x27e   : > { %v1062_v16 = vpop.permute.xlu0 %1061 }
 0x27f   : > { %v1095_v28 = vrot.slane %v1062_v16, 4 }
 0x286   : > { %v1064_v17 = vpop.permute.xlu2 %1063  ;;  %v1060_v25 = vpop.permute.xlu0 %1059 }
 0x287   : > { %v1151_v30 = vrot.slane %v1064_v17, 4  ;;  %v1139_v31 = vrot.slane %v1060_v25, 4 }
 0x28e   : > { %v3451_v22 = vpop.permute.xlu2 %2954 }
 0x28f   : > { %v2957_v32 = vunpack.i.h.bf16 %v3451_v22  ;;  %v2956_v40 = vunpack.i.l.bf16 %v3451_v22 }
 0x291   : > { %v3479_v62 = vrot.slane %v2957_v32, 4  ;;  %v3485_v2 = vrot.slane %v2956_v40, 4 }
 0x296   : > { %v2970_v33 = vpop.permute.xlu2 %2969  ;;  %v1070_v34 = vpop.permute.xlu1 %1069 }
 0x297   : > { %v2972_v35 = vunpack.i.h.bf16 %v2970_v33  ;;  %v2971_v36 = vunpack.i.l.bf16 %v2970_v33  ;;  %v1093_v37 = vrot.slane %v1070_v34, 4  ;;  %v1096_v38 = vsel %vm837_vm9, %v1070_v34, %v1095_v28  ;;  %v1072_v39 = vpop.permute.xlu0 %1071 }
 0x298   : > { %v1104_v41 = vperm.slane %v1096_v38, %v3314_v3  ;;  %v1149_v42 = vrot.slane %v1072_v39, 4  ;;  %v1152_v43 = vsel %vm837_vm9, %v1072_v39, %v1151_v30 }
 0x299   : > { %v1395_v44 = vrot.slane %v2972_v35, 4  ;;  %v1393_v45 = vrot.slane %v2971_v36, 4  ;;  %v1094_v46 = vsel %vm837_vm9, %v1093_v37, %v1062_v16  ;;  %v1160_v47 = vperm.slane %v1152_v43, %v3314_v3 }
 0x29a   : > { %v1100_v48 = vperm.slane %v1094_v46, %v3314_v3  ;;  %v1117_v49 = vrot.slane %v1104_v41, 4  ;;  %v1120_v50 = vsel %vm837_vm9, %v1104_v41, %v1119_v27  ;;  %v1150_v53 = vsel %vm837_vm9, %v1149_v42, %v1064_v17 }
 0x29b   : > { %v1394_v54 = vsel %vm837_vm9, %v1393_v45, %v2972_v35  ;;  %v1396_v55 = vsel %vm837_vm9, %v2971_v36, %v1395_v44  ;;  %v1128_v51 = vperm.slane %v1120_v50, %v3331_v18  ;;  %v1156_v57 = vperm.slane %v1150_v53, %v3314_v3 }
 0x29c   : > { %v3471_v58 = vperm.slane %v1394_v54, %v3314_v3  ;;  %v3474_v59 = vperm.slane %v1396_v55, %v3314_v3  ;;  %v1105_v60 = vrot.slane %v1100_v48, 4  ;;  %v1108_v61 = vsel %vm837_vm9, %v1100_v48, %v1107_v29 }
 0x29d   : > { %v1116_v63 = vperm.slane %v1108_v61, %v3331_v18  ;;  %v1118_v0 = vsel %vm837_vm9, %v1117_v49, %v1092_v26  ;;  %v1135_v1 = vrot.slane %v1128_v51, 4  ;;  %v1161_v8 = vrot.slane %v1156_v57, 4 }
 0x29e   : > { %v1106_v4 = vsel %vm837_vm9, %v1105_v60, %v1088_v24  ;;  %v1124_v5 = vperm.slane %v1118_v0, %v3331_v18  ;;  %v1405_v14 = vrot.slane %v3471_v58, 4  ;;  %v1417_v21 = vrot.slane %v3474_v59, 4 }
 0x29f   : > { %v1112_v15 = vperm.slane %v1106_v4, %v3331_v18  ;;  %v1131_v16 = vrot.slane %v1116_v63, 4  ;;  %v3492_v17 = vsel %vm837_vm9, 0.0, %v1135_v1  ;;  %v1068_v19 = vpop.permute.xlu1 %1067  ;;  %v2965_v20 = vpop.permute.xlu0 %2964  ;;  %v1173_v26 = vrot.slane %v1160_v47, 4 }
 0x2a0   : > { %v1133_v23 = vrot.slane %v1124_v5, 4  ;;  %v1137_v27 = vrot.slane %v1068_v19, 4  ;;  %v1140_v29 = vsel %vm837_vm9, %v1068_v19, %v1139_v31  ;;  %v2967_v30 = vunpack.i.h.bf16 %v2965_v20 }
 0x2a1   : > { %v1129_v28 = vrot.slane %v1112_v15, 4  ;;  %v1132_v24 = vsel %vm837_vm9, 0.0, %v1131_v16  ;;  %v3498_v33 = vsel %vm837_vm9, %v1135_v1, %v1124_v5  ;;  %v1209_v34 = vrot.slane %v3492_v17, 4 }
 0x2a2   : > { %v1138_v35 = vsel %vm837_vm9, %v1137_v27, %v1060_v25  ;;  %v1148_v36 = vperm.slane %v1140_v29, %v3314_v3  ;;  %v1198_v37 = vrot.slane %v1132_v24, 4  ;;  %v1383_v39 = vrot.slane %v2967_v30, 4 }
 0x2a3   : > { %v1144_v38 = vperm.slane %v1138_v35, %v3314_v3  ;;  %v2966_v41 = vunpack.i.l.bf16 %v2965_v20  ;;  %v3505_v42 = vsel %vm837_vm9, 0.0, %v1133_v23  ;;  %v1130_v44 = vsel %vm837_vm9, 0.0, %v1129_v28 }
 0x2a4   : > { %v1174_v31 = vsel %vm837_vm9, %v1173_v26, %v1148_v36  ;;  %v1175_v43 = vrot.slane %v1148_v36, 4  ;;  %v1193_v54 = vsel %vm837_vm9, %v1131_v16, %v1112_v15  ;;  %v1199_v63 = vsel %vm837_vm9, %v1198_v37, %v1130_v44 }
 0x2a5   : > { %v1162_v45 = vsel %vm837_vm9, %v1161_v8, %v1144_v38  ;;  %v1163_v46 = vrot.slane %v1144_v38, 4  ;;  %v1180_v25 = vperm.slane %v1174_v31, %v3331_v18  ;;  %v1381_v48 = vrot.slane %v2966_v41, 4 }
 0x2a6   : > { %v3512_v49 = vperm.slane %v1162_v45, %v3331_v18  ;;  %v1176_v50 = vsel %vm837_vm9, %v1160_v47, %v1175_v43  ;;  %v1384_v53 = vsel %vm837_vm9, %v2966_v41, %v1383_v39  ;;  %v1210_v22 = vsel %vm837_vm9, %v1209_v34, %v3505_v42 }
 0x2a7   : > { %v1164_v55 = vsel %vm837_vm9, %v1156_v57, %v1163_v46  ;;  %v1184_v51 = vperm.slane %v1176_v50, %v3331_v18  ;;  %v1382_v60 = vsel %vm837_vm9, %v1381_v48, %v2967_v30  ;;  %v2960_v61 = vpop.permute.xlu1 %2959  ;;  %v1189_v1 = vrot.slane %v1180_v25, 4 }
 0x2a8   : > { %v1172_v0 = vperm.slane %v1164_v55, %v3331_v18  ;;  %v1388_v4 = vperm.slane %v1382_v60, %v3314_v3  ;;  %v1392_v47 = vperm.slane %v1384_v53, %v3314_v3  ;;  %v1185_v5 = vrot.slane %v3512_v49, 4 }
 0x2a9   : > { %v1191_v8 = vrot.slane %v1184_v51, 4  ;;  %v2962_v15 = vunpack.i.h.bf16 %v2960_v61  ;;  %v3526_v57 = vperm.slane %v1193_v54, %v3314_v3  ;;  %v2961_v24 = vunpack.i.l.bf16 %v2960_v61 }
 0x2aa   : > { %v3528_v16 = vrot.slane %v1172_v0, 4  ;;  %v1406_v19 = vsel %vm837_vm9, %v1405_v14, %v1388_v4  ;;  %v1407_v20 = vrot.slane %v1388_v4, 4  ;;  %v1418_v23 = vsel %vm837_vm9, %v1417_v21, %v1392_v47 }
 0x2ab   : > { %v1192_v26 = vsel %vm837_vm9, 0.0, %v1191_v8  ;;  %v1258_v27 = vsel %vm837_vm9, %v1191_v8, %v1180_v25  ;;  %v1419_v28 = vrot.slane %v1392_v47, 4  ;;  %v1190_v30 = vsel %vm837_vm9, 0.0, %v1189_v1 }
 0x2ac   : > { %v3536_v29 = vsel %vm837_vm9, 0.0, %v3528_v16  ;;  %v1408_v35 = vsel %vm837_vm9, %v3471_v58, %v1407_v20  ;;  %v3542_v14 = vperm.slane %v1406_v19, %v3331_v18  ;;  %v1263_v36 = vrot.slane %v1192_v26, 4 }
 0x2ad   : > { %v1416_v21 = vperm.slane %v1408_v35, %v3331_v18  ;;  %v1420_v37 = vsel %vm837_vm9, %v3474_v59, %v1419_v28  ;;  %v3548_v38 = vperm.slane %v1418_v23, %v3331_v18  ;;  %v3551_v39 = vperm.slane %v1258_v27, %v3314_v3 }
 0x2ae   : > { %v1428_v41 = vperm.slane %v1420_v37, %v3331_v18  ;;  %v1337_v31 = vrot.slane %v2962_v15, 4  ;;  %v1340_v58 = vsel %vm837_vm9, %v2962_v15, %v3479_v62  ;;  %v1325_v46 = vrot.slane %v2961_v24, 4 }
 0x2af   : > { %v3556_v43 = vrot.slane %v1416_v21, 4  ;;  %v1433_v44 = vrot.slane %v3548_v38, 4  ;;  %v1348_v45 = vperm.slane %v1340_v58, %v3314_v3  ;;  %v1328_v48 = vsel %vm837_vm9, %v2961_v24, %v3485_v2 }
 0x2b0   : > { %v3560_v59 = vrot.slane %v1428_v41, 4  ;;  %v1338_v25 = vsel %vm837_vm9, %v1337_v31, %v2957_v32  ;;  %v1203_v50 = vperm.slane %v1199_v63, %v3314_v3  ;;  %v1264_v62 = vsel %vm837_vm9, %v1263_v36, %v1190_v30 }
 0x2b1   : > { %v1429_v53 = vrot.slane %v3542_v14, 4  ;;  %v1344_v54 = vperm.slane %v1338_v25, %v3314_v3  ;;  %v1361_v55 = vrot.slane %v1348_v45, 4  ;;  %v3573_v51 = vsel %vm837_vm9, 0.0, %v3556_v43 }
 0x2b2   : > { %v3576_v60 = vsel %vm837_vm9, 0.0, %v1433_v44  ;;  %v1326_v32 = vsel %vm837_vm9, %v1325_v46, %v2956_v40  ;;  %v1336_v2 = vperm.slane %v1328_v48, %v3314_v3  ;;  %v3584_v61 = vsel %vm837_vm9, 0.0, %v3560_v59 }
 0x2b3   : > { %v1349_v63 = vrot.slane %v1344_v54, 4  ;;  %v1332_v0 = vperm.slane %v1326_v32, %v3314_v3  ;;  %v1208_v1 = vperm.slane %v3498_v33, %v3314_v3  ;;  %v1215_v40 = vrot.slane %v1203_v50, 4 }
 0x2b4   : > { %v1362_v4 = vsel %vm837_vm9, %v1361_v55, %v1336_v2  ;;  %v1363_v47 = vrot.slane %v1336_v2, 4  ;;  %v1214_v20 = vperm.slane %v1210_v22, %v3314_v3  ;;  %v1496_v23 = vrot.slane %v3573_v51, 4 }
 0x2b5   : > { %v1350_v8 = vsel %vm837_vm9, %v1349_v63, %v1332_v0  ;;  %v1351_v15 = vrot.slane %v1332_v0, 4  ;;  %v3596_v19 = vperm.slane %v1362_v4, %v3331_v18  ;;  %v1216_v17 = vsel %vm837_vm9, %v1215_v40, %v3526_v57 }
 0x2b6   : > { %v3601_v33 = vperm.slane %v1350_v8, %v3331_v18  ;;  %v1364_v26 = vsel %vm837_vm9, %v1348_v45, %v1363_v47  ;;  %v1507_v34 = vrot.slane %v3584_v61, 4  ;;  %v1222_v28 = vperm.slane %v1216_v17, %v3331_v18 }
 0x2b7   : > { %v1352_v42 = vsel %vm837_vm9, %v1344_v54, %v1351_v15  ;;  %v1372_v27 = vperm.slane %v1364_v26, %v3331_v18  ;;  %v1377_v30 = vrot.slane %v3596_v19, 4  ;;  %v1217_v35 = vrot.slane %v3526_v57, 4 }
 0x2b8   : > { %v1360_v24 = vperm.slane %v1352_v42, %v3331_v18  ;;  %v1227_v36 = vrot.slane %v1214_v20, 4  ;;  %v1373_v21 = vrot.slane %v3601_v33, 4  ;;  %v1229_v41 = vrot.slane %v1208_v1, 4 }
 0x2b9   : > { %v3614_v37 = vrot.slane %v1372_v27, 4  ;;  %v1241_v31 = vrot.slane %v1222_v28, 4  ;;  %v1247_v45 = vsel %vm837_vm9, %v3528_v16, %v3512_v49  ;;  %v1252_v48 = vrot.slane %v3536_v29, 4 }
 0x2ba   : > { %v3616_v58 = vrot.slane %v1360_v24, 4  ;;  %v1228_v44 = vsel %vm837_vm9, %v1227_v36, %v1208_v1  ;;  %v1251_v25 = vperm.slane %v1247_v45, %v3314_v3  ;;  %v1186_v55 = vsel %vm837_vm9, 0.0, %v1185_v5 }
 0x2bb   : > { %v3624_v46 = vsel %vm837_vm9, 0.0, %v3614_v37  ;;  %v1234_v57 = vperm.slane %v1228_v44, %v3331_v18  ;;  %v1268_v16 = vperm.slane %v1264_v62, %v3314_v3  ;;  %v1283_v32 = vrot.slane %v3551_v39, 4 }
 0x2bc   : > { %v3631_v54 = vsel %vm837_vm9, 0.0, %v3616_v58  ;;  %v1453_v2 = vrot.slane %v3624_v46, 4  ;;  %v1253_v1 = vsel %vm837_vm9, %v1252_v48, %v1186_v55  ;;  %v1271_v4 = vrot.slane %v1251_v25, 4 }
 0x2bd   : > { %v1239_v63 = vrot.slane %v1234_v57, 4  ;;  %v1242_v0 = vsel %vm837_vm9, %v1234_v57, %v1241_v31  ;;  %v1257_v29 = vperm.slane %v1253_v1, %v3314_v3  ;;  %v1284_v49 = vsel %vm837_vm9, %v1268_v16, %v1283_v32 }
 0x2be   : > { %2883 = vmatpush.xpose.msk.msra.mxu3 %vm1545_vm10, %v1242_v0  ;;  %v1281_v47 = vrot.slane %v1268_v16, 4  ;;  %v1292_v62 = vperm.slane %v1284_v49, %v3331_v18  ;;  %v1218_v22 = vsel %vm837_vm9, %v1203_v50, %v1217_v35  ;;  %v1230_v40 = vsel %vm837_vm9, %v1214_v20, %v1229_v41 }
 0x2bf   : > { %v1240_v5 = vsel %vm837_vm9, %v1239_v63, %v1222_v28  ;;  %v1272_v8 = vsel %vm837_vm9, %v1257_v29, %v1271_v4  ;;  %v1269_v15 = vrot.slane %v1257_v29, 4  ;;  %v1226_v17 = vperm.slane %v1218_v22, %v3331_v18 }
 0x2c0   : > { %2879 = vmatpush.xpose.msk.msra.mxu2 %vm1545_vm10, %v1240_v5  ;;  %v1282_v26 = vsel %vm837_vm9, %v1281_v47, %v3551_v39  ;;  %v1280_v42 = vperm.slane %v1272_v8, %v3331_v18  ;;  %v1297_v27 = vrot.slane %v1292_v62, 4  ;;  %v1238_v20 = vperm.slane %v1230_v40, %v3331_v18 }
 0x2c1   : > { %2884 = vmatmul.msk.f32.vlgmr.msra.gmra.mxu3 %vm1545_vm10, %v3423_v56  ;;  %v1288_v50 = vperm.slane %v1282_v26, %v3331_v18  ;;  %v1442_v28 = vrot.slane %v3631_v54, 4  ;;  %v1270_v24 = vsel %vm837_vm9, %v1269_v15, %v1251_v25  ;;  %v1245_v35 = vrot.slane %v1226_v17, 4 }
 0x2c2   : > { %v1491_v39 = vsel %vm837_vm9, %v3556_v43, %v3542_v14  ;;  %v1298_v56 = vsel %vm837_vm9, %v1297_v27, %v1280_v42  ;;  %v1276_v36 = vperm.slane %v1270_v24, %v3331_v18  ;;  %v1430_v31 = vsel %vm837_vm9, 0.0, %v1429_v53 }
 0x2c3   : > { %2880 = vmatmul.msk.f32.vlgmr.msra.gmra.mxu2 %vm1545_vm10, %v3418_v52  ;;  %v1293_v41 = vrot.slane %v1288_v50, 4  ;;  %v1299_v44 = vrot.slane %v1280_v42, 4  ;;  %2889 = vmatpush.xpose.msk.msrb.mxu3 %vm1545_vm10, %v1298_v56  ;;  %v1243_v45 = vrot.slane %v1238_v20, 4  ;;  %v1495_v57 = vperm.slane %v1491_v39, %v3314_v3 }
 0x2c4   : > { %v1497_v43 = vsel %vm837_vm9, %v1496_v23, %v1430_v31  ;;  %v1295_v25 = vrot.slane %v1276_v36, 4  ;;  %v1246_v48 = vsel %vm837_vm9, %v1238_v20, %v1245_v35  ;;  %v1502_v53 = vsel %vm837_vm9, %v3560_v59, %v3548_v38 }
 0x2c5   : > { %v1294_v52 = vsel %vm837_vm9, %v1293_v41, %v1276_v36  ;;  %v1501_v54 = vperm.slane %v1497_v43, %v3314_v3  ;;  %v1244_v14 = vsel %vm837_vm9, %v1243_v45, %v1226_v17  ;;  %v1508_v51 = vsel %vm837_vm9, %v1507_v34, %v3576_v60 }
 0x2c6   : > { %2881 = vmatpush.xpose.msk.msrb.mxu2 %vm1545_vm10, %v1294_v52  ;;  %v1515_v23 = vrot.slane %v1495_v57, 4  ;;  %v1296_v55 = vsel %vm837_vm9, %v1288_v50, %v1295_v25  ;;  %v1506_v16 = vperm.slane %v1502_v53, %v3314_v3  ;;  %v1512_v32 = vperm.slane %v1508_v51, %v3314_v3 }
 0x2c7   : > { %v1513_v63 = vrot.slane %v1501_v54, 4  ;;  %2885 = vmatpush.xpose.msk.msra.mxu1 %vm1545_vm10, %v1296_v55  ;;  %v1300_v0 = vsel %vm837_vm9, %v1292_v62, %v1299_v44  ;;  %v1437_v59 = vsel %vm837_vm9, %v3616_v58, %v3601_v33  ;;  %v1448_v60 = vsel %vm837_vm9, %v3614_v37, %v3596_v19 }
 0x2c8   : > { %v1516_v38 = vsel %vm837_vm9, %v1501_v54, %v1515_v23  ;;  %v1525_v34 = vrot.slane %v1512_v32, 4  ;;  %v1527_v1 = vrot.slane %v1506_v16, 4  ;;  %v1374_v29 = vsel %vm837_vm9, 0.0, %v1373_v21 }
 0x2c9   : > { %2890 = vmatmul.msk.f32.vlgmr.msrb.gmra.mxu3 %vm1545_vm10, %v3448_v13  ;;  %v1514_v61 = vsel %vm837_vm9, %v1513_v63, %v1495_v57  ;;  %v1441_v58 = vperm.slane %v1437_v59, %v3314_v3  ;;  %v1443_v49 = vsel %vm837_vm9, %v1442_v28, %v1374_v29  ;;  %v1452_v37 = vperm.slane %v1448_v60, %v3314_v3 }
 0x2ca   : > { %2887 = vmatpush.xpose.msk.msra.mxu2 %vm1545_vm10, %v1244_v14  ;;  %v1520_v4 = vperm.slane %v1514_v61, %v3331_v18  ;;  %v1378_v13 = vsel %vm837_vm9, 0.0, %v1377_v30  ;;  %v1526_v47 = vsel %vm837_vm9, %v1525_v34, %v1506_v16  ;;  %2886 = vmatmul.msk.f32.vlgmr.msra.gmra.mxu1 %vm1545_vm10, %v3433_v6  ;;  %v1528_v33 = vsel %vm837_vm9, %v1512_v32, %v1527_v1 }
 0x2cb   : > { %2891 = vmatpush.xpose.msk.msrb.mxu1 %vm1545_vm10, %v1246_v48  ;;  %2882 = vmatmul.msk.f32.vlgmr.msrb.gmra.mxu2 %vm1545_vm10, %v3445_v11  ;;  %v1447_v21 = vperm.slane %v1443_v49, %v3314_v3  ;;  %v1532_v5 = vperm.slane %v1526_v47, %v3331_v18  ;;  %v1536_v19 = vperm.slane %v1528_v33, %v3331_v18  ;;  %v1461_v22 = vrot.slane %v1441_v58, 4 }
 0x2cc   : > { %v1454_v30 = vsel %vm837_vm9, %v1453_v2, %v1378_v13  ;;  %v1473_v40 = vrot.slane %v1452_v37, 4  ;;  %v1539_v8 = vrot.slane %v1520_v4, 4  ;;  %v1524_v15 = vperm.slane %v1516_v38, %v3331_v18 }
 0x2cd   : > { %v1458_v11 = vperm.slane %v1454_v30, %v3314_v3  ;;  %v1459_v62 = vrot.slane %v1447_v21, 4  ;;  %v1537_v6 = vrot.slane %v1532_v5, 4  ;;  %v1541_v26 = vrot.slane %v1536_v19, 4 }
 0x2ce   : > { %2893 = vmatpush.xpose.msk.msrb.mxu2 %vm1545_vm10, %v1300_v0  ;;  %v1462_v27 = vsel %vm837_vm9, %v1447_v21, %v1461_v22  ;;  %v1540_v41 = vsel %vm837_vm9, %v1532_v5, %v1539_v8 }
 0x2cf   : > { %v1460_v17 = vsel %vm837_vm9, %v1459_v62, %v1441_v58  ;;  %v1471_v42 = vrot.slane %v1458_v11, 4  ;;  %v1474_v50 = vsel %vm837_vm9, %v1458_v11, %v1473_v40  ;;  %v1538_v46 = vsel %vm837_vm9, %v1537_v6, %v1520_v4 }
 0x2d0   : > { %v1466_v2 = vperm.slane %v1460_v17, %v3331_v18  ;;  %v1470_v20 = vperm.slane %v1462_v27, %v3331_v18  ;;  %1915 = vmatpush.msrb.mxu0 %v1538_v46  ;;  %v1542_v28 = vsel %vm837_vm9, %v1541_v26, %v1524_v15  ;;  %v1482_v35 = vperm.slane %v1474_v50, %v3331_v18 }
 0x2d1   : > { %v1472_v24 = vsel %vm837_vm9, %v1471_v42, %v1452_v37 }
 0x2d2   : > { %2007 = vmatpush.msra.mxu0 %v1542_v28  ;;  %v1478_v39 = vperm.slane %v1472_v24, %v3331_v18  ;;  %v1485_v56 = vrot.slane %v1466_v2, 4  ;;  %v1489_v36 = vrot.slane %v1470_v20, 4  ;;  %v1487_v31 = vrot.slane %v1482_v35, 4  ;;  %2892 = vmatmul.msk.f32.vlgmr.msrb.gmra.mxu1 %vm1545_vm10, %v3436_v7 }
 0x2d3   : > { %2888 = vmatmul.msk.f32.vlgmr.msra.gmra.mxu2 %vm1545_vm10, %v3439_v9  ;;  %v1543_v9 = vrot.slane %v1524_v15, 4 }
 0x2d4   : > { %v1483_v44 = vrot.slane %v1478_v39, 4  ;;  %1961 = vmatpush.msra.mxu2 %v1540_v41  ;;  %v1486_v45 = vsel %vm837_vm9, %v1478_v39, %v1485_v56  ;;  %v1490_v57 = vsel %vm837_vm9, %v1482_v35, %v1489_v36  ;;  %v1488_v52 = vsel %vm837_vm9, %v1487_v31, %v1470_v20 }
 0x2d5   : > { %1938 = vmatpush.msra.mxu1 %v1486_v45  ;;  %v1544_v7 = vsel %vm837_vm9, %v1536_v19, %v1543_v9 }
 0x2d6   : > { %v1484_v43 = vsel %vm837_vm9, %v1483_v44, %v1466_v2 }
 0x2d7   : > { %2030 = vmatpush.msrb.mxu1 %v1490_v57  ;;  %1892 = vmatpush.msra.mxu3 %v1484_v43 }
 0x2d9   : > { %1984 = vmatpush.msrb.mxu3 %v1488_v52 }
 0x2db   : > { %2894 = vmatmul.msk.f32.vlgmr.msrb.gmra.mxu2 %vm1545_vm10, %v3442_v10 }
 0x2dc   : > { %2053 = vmatpush.msrb.mxu2 %v1544_v7 }
 0x344   : > { %v1621_v25 = vpop.f32.mrf.mxu3 }
 0x345   : > { %v1760_v48 = vsel %vm1545_vm10, %v1621_v25, -inf }
 0x346   : > { %v1569_v54 = vpop.f32.mrf.mxu2  ;;  %1761 = vmax.xlane.f32.xlu0 %v1760_v48 }
 0x347   : > { %v1754_v14 = vsel %vm1545_vm10, %v1569_v54, -inf  ;;  %v1647_v53 = vpop.f32.mrf.mxu1 }
 0x348   : > { %1755 = vmax.xlane.f32.xlu1 %v1754_v14  ;;  %v1763_v23 = vsel %vm1545_vm10, %v1647_v53, -inf }
 0x34c   : > { %v1699_v10 = vpop.f32.mrf.mxu3 }
 0x34d   : > { %v1769_v32 = vsel %vm1545_vm10, %v1699_v10, -inf }
 0x34e   : > { %v1595_v51 = vpop.f32.mrf.mxu2 }
 0x34f   : > { %v1757_v55 = vsel %vm1545_vm10, %v1595_v51, -inf  ;;  %v1725_v0 = vpop.f32.mrf.mxu1 }
 0x350   : > { %1764 = vmax.xlane.f32.xlu1 %v1763_v23  ;;  %1758 = vmax.xlane.f32.xlu0 %v1757_v55  ;;  %v1772_v59 = vsel %vm1545_vm10, %v1725_v0, -inf }
 0x356   : > { %v1673_v16 = vpop.f32.mrf.mxu2 }
 0x357   : > { %v1766_v63 = vsel %vm1545_vm10, %v1673_v16, -inf }
 0x358   : > { %1770 = vmax.xlane.f32.xlu0 %v1769_v32  ;;  %1767 = vmax.xlane.f32.xlu2 %v1766_v63 }
 0x35e   : > { %v1751_v38 = vpop.f32.mrf.mxu2 }
 0x35f   : > { %v1775_v60 = vsel %vm1545_vm10, %v1751_v38, -inf }
 0x360   : > { %1773 = vmax.xlane.f32.xlu2 %v1772_v59  ;;  %1776 = vmax.xlane.f32.xlu1 %v1775_v60 }
 0x3b9   : > { %v3759_v61 = vpop.xlane.xlu0 %1761 }
 0x3ba   : > { %v1780_v34 = vmax.f32 %v3759_v61, -3.4028235e+38 }
 0x3bb   : > { %v3762_v1 = vpop.xlane.xlu1 %1755 }
 0x3bc   : > { %v1778_v29 = vmax.f32 %v3762_v1, -3.4028235e+38  ;;  %v1812_v4 = vsub.f32 %v1621_v25, %v1780_v34 }
 0x3be   : > { %v1810_v58 = vsub.f32 %v1569_v54, %v1778_v29  ;;  %v1822_v49 = vmul.f32 1.442695, %v1812_v4  ;;  %v1786_v14 = vsub.f32 -3.4028235e+38, %v1778_v29 }
 0x3c0   : > { %v1818_v37 = vmul.f32 1.442695, %v1810_v58  ;;  %2987 = vpow2.f32 %v1822_v49 }
 0x3c2   : > { %2989 = vpow2.f32 %v1818_v37 }
 0x3c3   : > { %v3769_v13 = vpop.xlane.xlu1 %1764  ;;  %v3771_v47 = vpop.xlane.xlu0 %1758 }
 0x3c4   : > { %v1781_v33 = vmax.f32 %v3769_v13, -3.4028235e+38  ;;  %v1779_v21 = vmax.f32 %v3771_v47, -3.4028235e+38 }
 0x3c6   : > { %v1813_v5 = vsub.f32 %v1647_v53, %v1781_v33  ;;  %v1811_v19 = vsub.f32 %v1595_v51, %v1779_v21  ;;  %v2988_v30 = vpop.eup %2987  ;;  %v1794_v53 = vmul.f32 1.442695, %v1786_v14  ;;  %v1787_v60 = vsub.f32 -3.4028235e+38, %v1779_v21 }
 0x3c7   : > { %2897 = vmatmul.msk.f32.vlgmr.msra.gmra.mxu1 %vm1545_vm10, %v2988_v30  ;;  %v1848_v9 = vsel %vm1545_vm10, %v2988_v30, 0.0 }
 0x3c8   : > { %v1824_v11 = vmul.f32 1.442695, %v1813_v5  ;;  %v2990_v62 = vpop.eup %2989  ;;  %v1820_v22 = vmul.f32 1.442695, %v1811_v19  ;;  %v1796_v37 = vmul.f32 1.442695, %v1787_v60 }
 0x3c9   : > { %2895 = vmatmul.msk.f32.vlgmr.msra.gmra.mxu3 %vm1545_vm10, %v2990_v62  ;;  %v1842_v40 = vsel %vm1545_vm10, %v2990_v62, 0.0 }
 0x3ca   : > { %2991 = vpow2.f32 %v1824_v11  ;;  %1843 = vadd.xlane.f32.xlu1 %v1842_v40 }
 0x3cb   : > { %v1768_v6 = vpop.xlane.xlu2 %1767  ;;  %v1771_v8 = vpop.xlane.xlu0 %1770  ;;  %2993 = vpow2.f32 %v1820_v22 }
 0x3cc   : > { %v1782_v15 = vmax.f32 %v1768_v6, -3.4028235e+38  ;;  %v1783_v26 = vmax.f32 %v1771_v8, -3.4028235e+38 }
 0x3ce   : > { %v1814_v17 = vsub.f32 %v1673_v16, %v1782_v15  ;;  %v1815_v42 = vsub.f32 %v1699_v10, %v1783_v26  ;;  %v1790_v23 = vsub.f32 -3.4028235e+38, %v1782_v15  ;;  %v1791_v10 = vsub.f32 -3.4028235e+38, %v1783_v26 }
 0x3d0   : > { %v1826_v27 = vmul.f32 1.442695, %v1814_v17  ;;  %v2992_v50 = vpop.eup %2991  ;;  %v1828_v46 = vmul.f32 1.442695, %v1815_v42  ;;  %v1802_v63 = vmul.f32 1.442695, %v1790_v23 }
 0x3d1   : > { %2898 = vmatmul.msk.f32.vlgmr.msra.gmra.mxu2 %vm1545_vm10, %v2992_v50  ;;  %v2994_v2 = vpop.eup %2993  ;;  %v1851_v25 = vsel %vm1545_vm10, %v2992_v50, 0.0  ;;  %v1804_v59 = vmul.f32 1.442695, %v1791_v10 }
 0x3d2   : > { %2995 = vpow2.f32 %v1826_v27  ;;  %2896 = vmatmul.msk.f32.vlgmr.msrb.gmra.mxu0 %vm1545_vm10, %v2994_v2  ;;  %v1845_v54 = vsel %vm1545_vm10, %v2994_v2, 0.0 }
 0x3d3   : > { %v1774_v20 = vpop.xlane.xlu2 %1773  ;;  %v1777_v28 = vpop.xlane.xlu1 %1776  ;;  %2997 = vpow2.f32 %v1828_v46 }
 0x3d4   : > { %v1784_v24 = vmax.f32 %v1774_v20, -3.4028235e+38  ;;  %v1785_v35 = vmax.f32 %v1777_v28, -3.4028235e+38 }
 0x3d6   : > { %v1816_v39 = vsub.f32 %v1725_v0, %v1784_v24  ;;  %v1817_v56 = vsub.f32 %v1751_v38, %v1785_v35  ;;  %v1788_v0 = vsub.f32 -3.4028235e+38, %v1780_v34  ;;  %v1789_v38 = vsub.f32 -3.4028235e+38, %v1781_v33 }
 0x3d7   : > { %v1792_v1 = vsub.f32 -3.4028235e+38, %v1784_v24  ;;  %v1793_v4 = vsub.f32 -3.4028235e+38, %v1785_v35 }
 0x3d8   : > { %v1830_v36 = vmul.f32 1.442695, %v1816_v39  ;;  %v2996_v41 = vpop.eup %2995  ;;  %v1832_v31 = vmul.f32 1.442695, %v1817_v56  ;;  %v1798_v29 = vmul.f32 1.442695, %v1788_v0 }
 0x3d9   : > { %2899 = vmatmul.msk.f32.vlgmr.msrb.gmra.mxu3 %vm1545_vm10, %v2996_v41  ;;  %v1854_v44 = vsel %vm1545_vm10, %v2996_v41, 0.0  ;;  %v2998_v45 = vpop.eup %2997  ;;  %v1800_v58 = vmul.f32 1.442695, %v1789_v38  ;;  %v1806_v5 = vmul.f32 1.442695, %v1792_v1 }
 0x3da   : > { %2999 = vpow2.f32 %v1830_v36  ;;  %1855 = vadd.xlane.f32.xlu2 %v1854_v44  ;;  %2900 = vmatmul.msk.f32.vlgmr.msra.gmra.mxu0 %vm1545_vm10, %v2998_v45  ;;  %v1857_v57 = vsel %vm1545_vm10, %v2998_v45, 0.0  ;;  %v1808_v61 = vmul.f32 1.442695, %v1793_v4 }
 0x3db   : > { %3001 = vpow2.f32 %v1832_v31  ;;  %1858 = vadd.xlane.f32.xlu1 %v1857_v57 }
 0x3dc   : > { %3003 = vpow2.f32 %v1794_v53 }
 0x3e0   : > { %v3000_v43 = vpop.eup %2999 }
 0x3e1   : > { %2901 = vmatmul.msk.f32.vlgmr.msrb.gmra.mxu1 %vm1545_vm10, %v3000_v43  ;;  %v1860_v52 = vsel %vm1545_vm10, %v3000_v43, 0.0  ;;  %v3002_v7 = vpop.eup %3001 }
 0x3e2   : > { %1861 = vadd.xlane.f32.xlu0 %v1860_v52  ;;  %1849 = vadd.xlane.f32.xlu2 %v1848_v9  ;;  %v1863_v48 = vsel %vm1545_vm10, %v3002_v7, 0.0  ;;  %v3004_v51 = vpop.eup %3003 }
 0x3e3   : > { %2902 = vmatmul.msk.f32.vlgmr.msrb.gmra.mxu2 %vm1545_vm10, %v3002_v7  ;;  %1852 = vadd.xlane.f32.xlu1 %v1851_v25  ;;  %v1834_v55 = vmul.f32 0.0, %v3004_v51 }
 0x3ea   : > { %1864 = vadd.xlane.f32.xlu2 %v1863_v48  ;;  %1846 = vadd.xlane.f32.xlu0 %v1845_v54 }
 0x43d   : > { %v1844_v16 = vpop.xlane.xlu1 %1843 }
 0x43e   : > { %v1866_v32 = vadd.f32 %v1844_v16, %v1834_v55 }
 0x440   : > { %3005 = vrcp.f32 %v1866_v32  ;;  %v2077_v21 = vand.u32 2147483648, %v1866_v32  ;;  %vm2071_vm12 = vweird.f32 %v1866_v32  ;;  %v2075_v62 = vand.u32 2147483647, %v1866_v32 }
 0x441   : > { %3007 = vpow2.f32 %v1802_v63 }
 0x442   : > { %3009 = vpow2.f32 %v1804_v59  ;;  %v2078_v46 = vor.u32 1.1754944e-38, %v2077_v21  ;;  %vm2076_vm14 = vcmp.eq.f32.partialorder %v2075_v62, 8.507059e+37 }
 0x443   : > { %3011 = vpow2.f32 %v1798_v29 }
 0x444   : > { %3013 = vpow2.f32 %v1800_v58  ;;  %v1940_v36 = vpop.f32.mrf.mxu1 }
 0x445   : > { %3015 = vpow2.f32 %v1796_v37 }
 0x446   : > { %v3006_v49 = vpop.eup %3005  ;;  %3017 = vpow2.f32 %v1806_v5 }
 0x447   : > { %v2067_v19 = vmul.f32 %v3006_v49, %v1866_v32  ;;  %v3008_v34 = vpop.eup %3007  ;;  %vm2072_vm11 = vweird.f32 %v3006_v49  ;;  %3019 = vpow2.f32 %v1808_v61 }
 0x448   : > { %v3010_v33 = vpop.eup %3009  ;;  %v3803_v30 = vmul.f32 0.0, %v3008_v34  ;;  %vm3805_vm13 = vmor %vm2071_vm12, %vm2072_vm11 }
 0x449   : > { %v2068_v13 = vsub.f32 1.0, %v2067_v19  ;;  %v3012_v40 = vpop.eup %3011  ;;  %v1839_v15 = vmul.f32 0.0, %v3010_v33 }
 0x44a   : > { %v3014_v26 = vpop.eup %3013  ;;  %v1836_v56 = vmul.f32 0.0, %v3012_v40 }
 0x44b   : > { %v2069_v47 = vmul.f32 %v3006_v49, %v2068_v13  ;;  %v3016_v27 = vpop.eup %3015  ;;  %v1837_v41 = vmul.f32 0.0, %v3014_v26 }
 0x44c   : > { %v1894_v50 = vpop.f32.mrf.mxu3  ;;  %v3018_v28 = vpop.eup %3017  ;;  %v1835_v45 = vmul.f32 0.0, %v3016_v27  ;;  %v3834_v53 = vadd.f32 %v1940_v36, %v1836_v56 }
 0x44d   : > { %v2070_v11 = vadd.f32 %v3006_v49, %v2069_v47  ;;  %v1856_v22 = vpop.xlane.xlu2 %1855  ;;  %v3020_v24 = vpop.eup %3019  ;;  %v2058_v39 = vadd.f32 %v1894_v50, %v1834_v55  ;;  %v3818_v31 = vmul.f32 0.0, %v3018_v28 }
 0x44e   : > { %v3810_v8 = vadd.f32 %v1856_v22, %v3803_v30  ;;  %v1859_v42 = vpop.xlane.xlu1 %1858  ;;  %v3823_v9 = vmul.f32 0.0, %v3020_v24 }
 0x44f   : > { %v2074_v17 = vsel %vm3805_vm13, %v3006_v49, %v2070_v11  ;;  %v3815_v2 = vadd.f32 %v1859_v42, %v1839_v15  ;;  %v1917_v20 = vpop.f32.mrf.mxu0 }
 0x450   : > { %3021 = vrcp.f32 %v3810_v8  ;;  %v2079_v35 = vsel %vm2076_vm14, %v2078_v46, %v2074_v17  ;;  %v2131_v52 = vand.u32 2147483647, %v3810_v8  ;;  %v2133_v14 = vand.u32 2147483648, %v3810_v8 }
 0x451   : > { %3023 = vrcp.f32 %v3815_v2  ;;  %v3820_v44 = vmul.f32 %v2079_v35, %v2058_v39  ;;  %v2145_v54 = vand.u32 2147483647, %v3815_v2  ;;  %v2147_v55 = vand.u32 2147483648, %v3815_v2 }
 0x452   : > { %vm2127_vm15 = vweird.f32 %v3810_v8  ;;  %v3840_v16 = vadd.f32 %v1917_v20, %v1835_v45  ;;  %vm2141_vm0 = vweird.f32 %v3815_v2  ;;  %vm3854_vm3 = vcmp.eq.f32.partialorder %v2131_v52, 8.507059e+37 }
 0x453   : > { %v2188_v60 = vrot.slane %v3820_v44, 4  ;;  %vm3850_vm2 = vcmp.eq.f32.partialorder %v2145_v54, 8.507059e+37  ;;  %v2134_v58 = vor.u32 1.1754944e-38, %v2133_v14  ;;  %v2148_v5 = vor.u32 1.1754944e-38, %v2147_v55 }
 0x454   : > { %v1963_v32 = vpop.f32.mrf.mxu2 }
 0x455   : > { %v1850_v57 = vpop.xlane.xlu2 %1849  ;;  %v1862_v43 = vpop.xlane.xlu0 %1861  ;;  %v3858_v37 = vadd.f32 %v1963_v32, %v1837_v41 }
 0x456   : > { %v3825_v7 = vpop.eup %3021  ;;  %v3827_v25 = vadd.f32 %v1850_v57, %v1836_v56  ;;  %v3830_v48 = vadd.f32 %v1862_v43, %v3818_v31  ;;  %v1853_v23 = vpop.xlane.xlu1 %1852 }
 0x457   : > { %v2123_v51 = vmul.f32 %v3825_v7, %v3810_v8  ;;  %v3024_v10 = vpop.eup %3023  ;;  %v3846_v59 = vadd.f32 %v1853_v23, %v1837_v41  ;;  %v2009_v1 = vpop.f32.mrf.mxu0  ;;  %vm2128_vm4 = vweird.f32 %v3825_v7 }
 0x458   : > { %3025 = vrcp.f32 %v3827_v25  ;;  %v2105_v63 = vand.u32 2147483648, %v3827_v25  ;;  %v2137_v38 = vmul.f32 %v3024_v10, %v3815_v2  ;;  %v2103_v19 = vand.u32 2147483647, %v3827_v25  ;;  %vm2129_vm8 = vmor %vm2127_vm15, %vm2128_vm4 }
 0x459   : > { %v2124_v0 = vsub.f32 1.0, %v2123_v51  ;;  %3027 = vrcp.f32 %v3830_v48  ;;  %vm2099_vm5 = vweird.f32 %v3827_v25  ;;  %v2117_v33 = vand.u32 2147483647, %v3846_v59 }
 0x45a   : > { %v2138_v49 = vsub.f32 1.0, %v2137_v38  ;;  %3029 = vrcp.f32 %v3846_v59  ;;  %v3862_v61 = vor.u32 1.1754944e-38, %v2105_v63  ;;  %v2063_v47 = vadd.f32 %v2009_v1, %v1839_v15 }
 0x45b   : > { %v2125_v13 = vmul.f32 %v3825_v7, %v2124_v0  ;;  %vm2142_vm6 = vweird.f32 %v3024_v10  ;;  %v2119_v40 = vand.u32 2147483648, %v3846_v59  ;;  %vm2113_vm7 = vweird.f32 %v3846_v59 }
 0x45c   : > { %v1986_v34 = vpop.f32.mrf.mxu3  ;;  %v2139_v21 = vmul.f32 %v3024_v10, %v2138_v49  ;;  %v2159_v46 = vand.u32 2147483647, %v3830_v48  ;;  %vm3888_vm11 = vcmp.eq.f32.partialorder %v2103_v19, 8.507059e+37  ;;  %vm2143_vm12 = vmor %vm2141_vm0, %vm2142_vm6  ;;  %vm2155_vm13 = vweird.f32 %v3830_v48 }
 0x45d   : > { %v1865_v11 = vpop.xlane.xlu2 %1864  ;;  %v1847_v62 = vpop.xlane.xlu0 %1846  ;;  %v2126_v6 = vadd.f32 %v3825_v7, %v2125_v13  ;;  %v2062_v50 = vadd.f32 %v1986_v34, %v3803_v30  ;;  %v2161_v8 = vand.u32 2147483648, %v3830_v48  ;;  %v2120_v2 = vor.u32 1.1754944e-38, %v2119_v40 }
 0x45e   : > { %v3868_v22 = vpop.eup %3025  ;;  %v3873_v26 = vadd.f32 %v1865_v11, %v3823_v9  ;;  %v3875_v17 = vadd.f32 %v1847_v62, %v1835_v45  ;;  %v2140_v27 = vadd.f32 %v3024_v10, %v2139_v21  ;;  %vm3909_vm0 = vcmp.eq.f32.partialorder %v2117_v33, 8.507059e+37 }
 0x45f   : > { %v3877_v42 = vpop.eup %3027  ;;  %v2095_v15 = vmul.f32 %v3868_v22, %v3827_v25  ;;  %v2130_v30 = vsel %vm2129_vm8, %v3825_v7, %v2126_v6  ;;  %vm2100_vm14 = vweird.f32 %v3868_v22  ;;  %v2032_v7 = vpop.f32.mrf.mxu1  ;;  %v2162_v40 = vor.u32 1.1754944e-38, %v2161_v8 }
 0x460   : > { %v2151_v28 = vmul.f32 %v3877_v42, %v3830_v48  ;;  %3031 = vrcp.f32 %v3873_v26  ;;  %v3030_v24 = vpop.eup %3029  ;;  %v2144_v39 = vsel %vm2143_vm12, %v3024_v10, %v2140_v27  ;;  %v2135_v56 = vsel %vm3854_vm3, %v2134_v58, %v2130_v30 }
 0x461   : > { %v2096_v35 = vsub.f32 1.0, %v2095_v15  ;;  %3033 = vrcp.f32 %v3875_v17  ;;  %v2109_v36 = vmul.f32 %v3030_v24, %v3846_v59  ;;  %v2149_v45 = vsel %vm3850_vm2, %v2148_v5, %v2144_v39  ;;  %vm3922_vm2 = vmor %vm2099_vm5, %vm2100_vm14 }
 0x462   : > { %v2152_v41 = vsub.f32 1.0, %v2151_v28  ;;  %vm2114_vm15 = vweird.f32 %v3030_v24  ;;  %v2182_v52 = vmul.f32 %v2135_v56, %v2062_v50  ;;  %v3913_v14 = vmul.f32 %v2149_v45, %v2063_v47 }
 0x463   : > { %v2097_v57 = vmul.f32 %v3868_v22, %v2096_v35  ;;  %v2110_v54 = vsub.f32 1.0, %v2109_v36  ;;  %v2089_v51 = vand.u32 2147483647, %v3875_v17  ;;  %v2091_v63 = vand.u32 2147483648, %v3875_v17  ;;  %vm3939_vm5 = vmor %vm2113_vm7, %vm2114_vm15 }
 0x464   : > { %v2153_v23 = vmul.f32 %v3877_v42, %v2152_v41  ;;  %v2186_v10 = vrot.slane %v2182_v52, 4  ;;  %v2189_v32 = vsel %vm837_vm9, %v2182_v52, %v2188_v60  ;;  %vm2085_vm3 = vweird.f32 %v3875_v17 }
 0x465   : > { %v2098_v55 = vadd.f32 %v3868_v22, %v2097_v57  ;;  %v2111_v1 = vmul.f32 %v3030_v24, %v2110_v54  ;;  %v2064_v29 = vadd.f32 %v2032_v7, %v3818_v31  ;;  %vm2156_vm4 = vweird.f32 %v3877_v42 }
 0x466   : > { %v3032_v0 = vpop.eup %3031  ;;  %v2187_v58 = vsel %vm837_vm9, %v2186_v10, %v3820_v44  ;;  %v2154_v49 = vadd.f32 %v3877_v42, %v2153_v23  ;;  %v2242_v19 = vrot.slane %v3913_v14, 4  ;;  %v2197_v34 = vperm.slane %v2189_v32, %v3314_v3  ;;  %vm2157_vm7 = vmor %vm2155_vm13, %vm2156_vm4 }
 0x467   : > { %v3034_v4 = vpop.eup %3033  ;;  %v2102_v60 = vsel %vm3922_vm2, %v3868_v22, %v2098_v55  ;;  %v2165_v25 = vmul.f32 %v3032_v0, %v3873_v26  ;;  %v2112_v5 = vadd.f32 %v3030_v24, %v2111_v1  ;;  %vm3946_vm6 = vcmp.eq.f32.partialorder %v2089_v51, 8.507059e+37 }
 0x468   : > { %v2081_v13 = vmul.f32 %v3034_v4, %v3875_v17  ;;  %v2092_v47 = vor.u32 1.1754944e-38, %v2091_v63  ;;  %v2107_v59 = vsel %vm3888_vm11, %v3862_v61, %v2102_v60  ;;  %v2193_v11 = vperm.slane %v2187_v58, %v3314_v3  ;;  %v2055_v61 = vpop.f32.mrf.mxu2 }
 0x469   : > { %v2166_v33 = vsub.f32 1.0, %v2165_v25  ;;  %v2116_v21 = vsel %vm3939_vm5, %v3030_v24, %v2112_v5  ;;  %v2158_v22 = vsel %vm2157_vm7, %v3877_v42, %v2154_v49  ;;  %vm2086_vm8 = vweird.f32 %v3034_v4 }
 0x46a   : > { %v2082_v62 = vsub.f32 1.0, %v2081_v13  ;;  %vm2160_vm12 = vcmp.eq.f32.partialorder %v2159_v46, 8.507059e+37  ;;  %v2180_v6 = vmul.f32 %v2107_v59, %v3834_v53  ;;  %v2121_v27 = vsel %vm3909_vm0, %v2120_v2, %v2116_v21  ;;  %vm2087_vm13 = vmor %vm2085_vm3, %vm2086_vm8 }
 0x46b   : > { %v2167_v48 = vmul.f32 %v3032_v0, %v2166_v33  ;;  %vm2170_vm11 = vweird.f32 %v3032_v0  ;;  %v2163_v50 = vsel %vm2160_vm12, %v2162_v40, %v2158_v22  ;;  %v2173_v28 = vand.u32 2147483647, %v3873_v26 }
 0x46c   : > { %v2083_v15 = vmul.f32 %v3034_v4, %v2082_v62  ;;  %v2200_v20 = vrot.slane %v2180_v6, 4  ;;  %v2175_v30 = vand.u32 2147483648, %v3873_v26  ;;  %v2184_v42 = vmul.f32 %v2163_v50, %v2064_v29 }
 0x46d   : > { %v2168_v46 = vadd.f32 %v3032_v0, %v2167_v48  ;;  %vm2169_vm14 = vweird.f32 %v3873_v26  ;;  %v2065_v53 = vadd.f32 %v2055_v61, %v3823_v9  ;;  %vm2174_vm0 = vcmp.eq.f32.partialorder %v2173_v28, 8.507059e+37 }
 0x46e   : > { %v2084_v24 = vadd.f32 %v3034_v4, %v2083_v15  ;;  %vm2171_vm15 = vmor %vm2169_vm14, %vm2170_vm11  ;;  %v2176_v8 = vor.u32 1.1754944e-38, %v2175_v30  ;;  %v2181_v35 = vmul.f32 %v2121_v27, %v3858_v37  ;;  %v2198_v56 = vrot.slane %v2184_v42, 4 }
 0x46f   : > { %v2201_v36 = vsel %vm837_vm9, %v2184_v42, %v2200_v20  ;;  %v2172_v2 = vsel %vm2171_vm15, %v3032_v0, %v2168_v46  ;;  %v2224_v41 = vrot.slane %v2197_v34, 4  ;;  %v2212_v26 = vrot.slane %v2193_v11, 4 }
 0x470   : > { %v2088_v39 = vsel %vm2087_vm13, %v3034_v4, %v2084_v24  ;;  %v2209_v45 = vperm.slane %v2201_v36, %v3314_v3  ;;  %v2177_v57 = vsel %vm2174_vm0, %v2176_v8, %v2172_v2  ;;  %v2199_v43 = vsel %vm837_vm9, %v2198_v56, %v2180_v6 }
 0x471   : > { %v2093_v17 = vsel %vm3946_vm6, %v2092_v47, %v2088_v39  ;;  %v2185_v52 = vmul.f32 %v2177_v57, %v2065_v53  ;;  %v2205_v37 = vperm.slane %v2199_v43, %v3314_v3  ;;  %v2256_v51 = vrot.slane %v2181_v35, 4 }
 0x472   : > { %v2179_v9 = vmul.f32 %v2093_v17, %v3840_v16  ;;  %v2222_v7 = vrot.slane %v2209_v45, 4  ;;  %v2225_v54 = vsel %vm837_vm9, %v2209_v45, %v2224_v41  ;;  %vm2432_vm2 = vcmask 130048  }
 0x473   : > { %v2233_v10 = vperm.slane %v2225_v54, %v3331_v18  ;;  %v2254_v32 = vrot.slane %v2185_v52, 4  ;;  %v2210_v63 = vrot.slane %v2205_v37, 4  ;;  %v2213_v0 = vsel %vm837_vm9, %v2205_v37, %v2212_v26 }
 0x474   : > { %v2243_v23 = vsel %vm837_vm9, %v2242_v19, %v2179_v9  ;;  %v2244_v55 = vrot.slane %v2179_v9, 4  ;;  %v2223_v16 = vsel %vm837_vm9, %v2222_v7, %v2197_v34  ;;  %v2221_v1 = vperm.slane %v2213_v0, %v3331_v18 }
 0x475   : > { %v2249_v38 = vperm.slane %v2243_v23, %v3314_v3  ;;  %v2229_v29 = vperm.slane %v2223_v16, %v3331_v18  ;;  %v2240_v4 = vrot.slane %v2233_v10, 4  ;;  %v2211_v58 = vsel %vm837_vm9, %v2210_v63, %v2193_v11 }
 0x476   : > { %v2245_v60 = vsel %vm837_vm9, %v3913_v14, %v2244_v55  ;;  %v2255_v49 = vsel %vm837_vm9, %v2254_v32, %v2181_v35  ;;  %v2257_v5 = vsel %vm837_vm9, %v2185_v52, %v2256_v51  ;;  %v2217_v31 = vperm.slane %v2211_v58, %v3331_v18 }
 0x477   : > { %v2253_v25 = vperm.slane %v2245_v60, %v3314_v3  ;;  %v2236_v19 = vrot.slane %v2221_v1, 4  ;;  %v2241_v34 = vsel %vm837_vm9, 0.0, %v2240_v4  ;;  %v2261_v13 = vperm.slane %v2255_v49, %v3314_v3 }
 0x478   : > { %v2314_v33 = vrot.slane %v2241_v34, 4  ;;  %v2265_v44 = vperm.slane %v2257_v5, %v3314_v3  ;;  %v2268_v47 = vrot.slane %v2249_v38, 4  ;;  %v2234_v11 = vrot.slane %v2217_v31, 4 }
 0x479   : > { %v2280_v14 = vrot.slane %v2253_v25, 4  ;;  %v2237_v59 = vsel %vm837_vm9, 0.0, %v2236_v19  ;;  %v2266_v21 = vrot.slane %v2261_v13, 4  ;;  %v2238_v62 = vrot.slane %v2229_v29, 4 }
 0x47a   : > { %v2303_v22 = vrot.slane %v2237_v59, 4  ;;  %v2269_v40 = vsel %vm837_vm9, %v2261_v13, %v2268_v47  ;;  %v2278_v6 = vrot.slane %v2265_v44, 4  ;;  %v2235_v50 = vsel %vm837_vm9, 0.0, %v2234_v11 }
 0x47b   : > { %v2281_v15 = vsel %vm837_vm9, %v2265_v44, %v2280_v14  ;;  %v2267_v61 = vsel %vm837_vm9, %v2266_v21, %v2249_v38  ;;  %v2277_v27 = vperm.slane %v2269_v40, %v3331_v18  ;;  %v2239_v30 = vsel %vm837_vm9, 0.0, %v2238_v62 }
 0x47c   : > { %v2289_v48 = vperm.slane %v2281_v15, %v3331_v18  ;;  %v2273_v20 = vperm.slane %v2267_v61, %v3331_v18  ;;  %v2279_v28 = vsel %vm837_vm9, %v2278_v6, %v2253_v25  ;;  %v2298_v24 = vsel %vm837_vm9, %v2236_v19, %v2217_v31 }
 0x47d   : > { %v2285_v42 = vperm.slane %v2279_v28, %v3331_v18  ;;  %v2292_v46 = vrot.slane %v2277_v27, 4  ;;  %v2302_v8 = vperm.slane %v2298_v24, %v3314_v3  ;;  %v2304_v35 = vsel %vm837_vm9, %v2303_v22, %v2235_v50 }
 0x47e   : > { %v2296_v53 = vrot.slane %v2289_v48, 4  ;;  %v2309_v39 = vsel %vm837_vm9, %v2240_v4, %v2229_v29  ;;  %v2315_v56 = vsel %vm837_vm9, %v2314_v33, %v2239_v30  ;;  %v2290_v36 = vrot.slane %v2273_v20, 4 }
 0x47f   : > { %v2294_v2 = vrot.slane %v2285_v42, 4  ;;  %v2308_v17 = vperm.slane %v2304_v35, %v3314_v3  ;;  %v2313_v45 = vperm.slane %v2309_v39, %v3314_v3  ;;  %v2319_v26 = vperm.slane %v2315_v56, %v3314_v3  ;;  %v2441_v35 = vld [vmem:[%s4218_s26 + $0x18] sm:$0xff]  ;;  %v2439_v39 = vld [vmem:[%s4218_s26 + $0x8] sm:$0xff]  ;;  %v2438_v56 = vld [vmem:[%s4218_s26] sm:$0xff] }
 0x480   : > { %v2297_v41 = vsel %vm837_vm9, 0.0, %v2296_v53  ;;  %v2322_v9 = vrot.slane %v2302_v8, 4  ;;  %v2291_v43 = vsel %vm837_vm9, 0.0, %v2290_v36  ;;  %v2293_v7 = vsel %vm837_vm9, 0.0, %v2292_v46  ;;  %2464 = vmatpush.msra.mxu3 %v2441_v35 }
 0x481   : > { %v2368_v57 = vrot.slane %v2297_v41, 4  ;;  %v2334_v52 = vrot.slane %v2313_v45, 4  ;;  %v2320_v37 = vrot.slane %v2308_v17, 4  ;;  %v2295_v54 = vsel %vm837_vm9, 0.0, %v2294_v2 }
 0x482   : > { %v2323_v51 = vsel %vm837_vm9, %v2308_v17, %v2322_v9  ;;  %v2332_v23 = vrot.slane %v2319_v26, 4  ;;  %v2352_v55 = vsel %vm837_vm9, %v2292_v46, %v2273_v20  ;;  %v2357_v10 = vrot.slane %v2293_v7, 4 }
 0x483   : > { %v2331_v32 = vperm.slane %v2323_v51, %v3331_v18  ;;  %v2335_v63 = vsel %vm837_vm9, %v2319_v26, %v2334_v52  ;;  %v2321_v0 = vsel %vm837_vm9, %v2320_v37, %v2302_v8  ;;  %v2356_v16 = vperm.slane %v2352_v55, %v3314_v3  ;;  %v3039_v55 = vld [vmem:[%s4198_s24] sm:$0xff] }
 0x484   : > { %v2343_v38 = vperm.slane %v2335_v63, %v3331_v18  ;;  %v2327_v1 = vperm.slane %v2321_v0, %v3331_v18  ;;  %v2333_v29 = vsel %vm837_vm9, %v2332_v23, %v2313_v45  ;;  %v2358_v4 = vsel %vm837_vm9, %v2357_v10, %v2291_v43 }
 0x485   : > { %v2350_v60 = vrot.slane %v2331_v32, 4  ;;  %v2339_v58 = vperm.slane %v2333_v29, %v3331_v18  ;;  %v2362_v25 = vperm.slane %v2358_v4, %v3314_v3  ;;  %v2363_v49 = vsel %vm837_vm9, %v2296_v53, %v2285_v42 }
 0x486   : > { %v2348_v5 = vrot.slane %v2343_v38, 4  ;;  %v2346_v31 = vrot.slane %v2327_v1, 4  ;;  %v2367_v19 = vperm.slane %v2363_v49, %v3314_v3  ;;  %v2369_v34 = vsel %vm837_vm9, %v2368_v57, %v2295_v54  ;;  %v2976_v54 = vld [vmem:[%s4219_s23] ss:$0 sm:$0xff] }
 0x487   : > { %v2351_v13 = vsel %vm837_vm9, %v2343_v38, %v2350_v60  ;;  %v2344_v33 = vrot.slane %v2339_v58, 4  ;;  %v2373_v44 = vperm.slane %v2369_v34, %v3314_v3  ;;  %v2376_v47 = vrot.slane %v2356_v16, 4 }
 0x488   : > { %2424 = vrot.lane.b32.xlu1 %v2351_v13, %s3079_s19  ;;  %v2349_v14 = vsel %vm837_vm9, %v2348_v5, %v2331_v32  ;;  %v2347_v59 = vsel %vm837_vm9, %v2339_v58, %v2346_v31  ;;  %v2388_v21 = vrot.slane %v2367_v19, 4  ;;  %v2374_v11 = vrot.slane %v2362_v25, 4  ;;  %v2534_v13 = vld [vmem:[%s3216_s1 + $0x18] sm:$0xff] }
 0x489   : > { %2416 = vrot.lane.b32.xlu2 %v2349_v14, %s3080_s21  ;;  %2408 = vrot.lane.b32.xlu0 %v2347_v59, %s3081_s13  ;;  %v2377_v62 = vsel %vm837_vm9, %v2362_v25, %v2376_v47  ;;  %v2386_v22 = vrot.slane %v2373_v44, 4  ;;  %v2345_v40 = vsel %vm837_vm9, %v2344_v33, %v2327_v1  ;;  %vm2435_vm3 = vcmask 195584   ;;  %v2533_v47 = vld [vmem:[%s3216_s1 + $0x10] sm:$0xff]  ;;  %v2532_v59 = vld [vmem:[%s3216_s1 + $0x8] sm:$0xff] }
 0x48a   : > { %v2385_v3 = vperm.slane %v2377_v62, %v3331_v18  ;;  %v2389_v6 = vsel %vm837_vm9, %v2373_v44, %v2388_v21  ;;  %v2375_v15 = vsel %vm837_vm9, %v2374_v11, %v2356_v16  ;;  %v3040_v16 = vld [vmem:[%s4198_s24 + $0x8] sm:$0xff]  ;;  %2557 = vmatpush.msrb.mxu0 %v2534_v13  ;;  %v2531_v21 = vld [vmem:[%s3216_s1] sm:$0xff]  ;;  %v2577_v62 = vld [vmem:[%s3226_s20 + $0x38] sm:$0xff]  ;;  %vm2582_vm8 = vcmask 523264  }
 0x48b   : > { %v2397_v61 = vperm.slane %v2389_v6, %v3331_v18  ;;  %v2381_v27 = vperm.slane %v2375_v15, %v3331_v18  ;;  %v2387_v48 = vsel %vm837_vm9, %v2386_v22, %v2367_v19  ;;  %v2576_v22 = vld [vmem:[%s3226_s20 + $0x30] sm:$0xff]  ;;  %2597 = vmatpush.msra.mxu1 %v2577_v62 }
 0x48c   : > { %v2393_v50 = vperm.slane %v2387_v48, %v3331_v18  ;;  %v2404_v20 = vrot.slane %v2385_v3, 4  ;;  %v2440_v18 = vld [vmem:[%s4218_s26 + $0x10] sm:$0xff]  ;;  %2558 = vmatpush.msrb.mxu0 %v2533_v47 }
 0x48d   : > { %v2402_v28 = vrot.slane %v2397_v61, 4  ;;  %v2400_v30 = vrot.slane %v2381_v27, 4  ;;  %2465 = vmatpush.msra.mxu3 %v2440_v18  ;;  %2598 = vmatpush.msra.mxu1 %v2576_v22 }
 0x48e   : > { %v2398_v24 = vrot.slane %v2393_v50, 4  ;;  %v2405_v42 = vsel %vm837_vm9, %v2397_v61, %v2404_v20  ;;  %2559 = vmatpush.msrb.mxu0 %v2532_v59  ;;  %v2573_v20 = vld [vmem:[%s3226_s20 + $0x18] sm:$0xff] }
 0x48f   : > { %v2403_v46 = vsel %vm837_vm9, %v2402_v28, %v2385_v3  ;;  %v2401_v53 = vsel %vm837_vm9, %v2393_v50, %v2400_v30  ;;  %2466 = vmatpush.msra.mxu3 %v2439_v39  ;;  %v2575_v3 = vld [vmem:[%s3226_s20 + $0x28] sm:$0xff] }
 0x490   : > { %v2399_v8 = vsel %vm837_vm9, %v2398_v24, %v2381_v27  ;;  %2560 = vmatpush.msrb.mxu0 %v2531_v21  ;;  %v2574_v27 = vld [vmem:[%s3226_s20 + $0x20] sm:$0xff]  ;;  %2599 = vmatpush.msra.mxu1 %v2575_v3 }
 0x491   : > { %2418 = vrot.lane.b32.xlu2 %v2403_v46, %s3080_s21  ;;  %2410 = vrot.lane.b32.xlu0 %v2401_v53, %s3081_s13  ;;  %v2977_v24 = vld [vmem:[%s692_s27] ss:$0 sm:$0xff] }
 0x492   : > { %2467 = vmatpush.msra.mxu3 %v2438_v56  ;;  %2600 = vmatpush.msra.mxu1 %v2574_v27  ;;  %v2978_v53 = vld [vmem:[%s695_s15] ss:$0 sm:$0xff] }
 0x494   : > { %2601 = vmatpush.msra.mxu1 %v2573_v20 }
 0x499   : > { %2426 = vrot.lane.b32.xlu0 %v2405_v42, %s3079_s19 }
 0x4e3   : > { %v2417_v2 = vpop.permute.xlu2 %2416 }
 0x4eb   : > { %v2419_v43 = vpop.permute.xlu2 %2418 }
 0x4fa   : > { %v2425_v17 = vpop.permute.xlu1 %2424 }
 0x4fb   : > { %v2409_v36 = vpop.permute.xlu0 %2408 }
 0x4fc   : > { %v2430_v41 = vsel %vm1545_vm10, %v2345_v40, %v2409_v36 }
 0x4fd   : > { %v2433_v45 = vsel %vm2432_vm2, %v2430_v41, %v2417_v2 }
 0x4fe   : > { %v2436_v57 = vsel %vm2435_vm3, %v2433_v45, %v2425_v17 }
 0x4ff   : > { %2903 = vmatmul.msk.f32.vlgmr.msra.gmra.mxu3 %vm717_vm1, %v2436_v57 }
 0x503   : > { %v2411_v26 = vpop.permute.xlu0 %2410 }
 0x504   : > { %v2431_v9 = vsel %vm1545_vm10, %v2399_v8, %v2411_v26 }
 0x505   : > { %v2434_v37 = vsel %vm2432_vm2, %v2431_v9, %v2419_v43  ;;  %v2572_v9 = vld [vmem:[%s3226_s20 + $0x10] sm:$0xff]  ;;  %v2571_v43 = vld [vmem:[%s3226_s20 + $0x8] sm:$0xff] }
 0x506   : > { %2602 = vmatpush.msra.mxu1 %v2572_v9 }
 0x508   : > { %2603 = vmatpush.msra.mxu1 %v2571_v43 }
 0x50b   : > { %v2427_v52 = vpop.permute.xlu0 %2426 }
 0x50c   : > { %v2437_v7 = vsel %vm2435_vm3, %v2434_v37, %v2427_v52  ;;  %v2570_v52 = vld [vmem:[%s3226_s20] sm:$0xff]  ;;  %s4220_s20 = scalar_lea.vmem %s4174_s10, %s3184_s22 }
 0x50d   : > { %2904 = vmatmul.msk.f32.gmra.mxu3 %vm717_vm1, %v2437_v7  ;;  %2604 = vmatpush.msra.mxu1 %v2570_v52  ;;  %v2979_v37 = vld [vmem:[%s681_s3] ss:$0 sm:$0xff] }
 0x582   : > { %v2469_v51 = vpop.f32.mrf.mxu3 }
 0x583   : > { %v2470_v23 = vadd.f32 %v2976_v54, %v2469_v51 }
 0x585   : > { %v4069_v10 = vadd.f32 %v3039_v55, %v2470_v23 }
 0x587   : > { %v2477_v32 = vsel %vm717_vm1, %v4069_v10, 0.0 }
 0x588   : > { %2478 = vadd.xlane.f32.xlu1 %v2477_v32 }
 0x590   : > { %v2472_v63 = vpop.f32.mrf.mxu3 }
 0x591   : > { %v2473_v0 = vadd.f32 %v2976_v54, %v2472_v63  ;;  %v2980_v63 = vld [vmem:[%s4220_s20] ss:$0 sm:$0xff] }
 0x593   : > { %v4076_v38 = vadd.f32 %v3040_v16, %v2473_v0 }
 0x595   : > { %v2480_v1 = vsel %vm717_vm1, %v4076_v38, 0.0 }
 0x596   : > { %2481 = vadd.xlane.f32.xlu2 %v2480_v1 }
 0x5fb   : > { %v2479_v29 = vpop.xlane.xlu1 %2478 }
 0x5fc   : > { %v2483_v4 = vmul.f32 %v2479_v29, %v3261_v12 }
 0x5fe   : > { %v2485_v60 = vsub.f32 %v4069_v10, %v2483_v4 }
 0x600   : > { %v2487_v58 = vmul.f32 %v2485_v60, %v2485_v60 }
 0x602   : > { %v2489_v25 = vsel %vm717_vm1, %v2487_v58, 0.0 }
 0x603   : > { %2490 = vadd.xlane.f32.xlu0 %v2489_v25 }
 0x609   : > { %v2482_v49 = vpop.xlane.xlu2 %2481 }
 0x60a   : > { %v2484_v5 = vmul.f32 %v2482_v49, %v3261_v12 }
 0x60c   : > { %v2486_v31 = vsub.f32 %v4076_v38, %v2484_v5 }
 0x60e   : > { %v2488_v19 = vmul.f32 %v2486_v31, %v2486_v31 }
 0x610   : > { %v2492_v34 = vsel %vm717_vm1, %v2488_v19, 0.0 }
 0x611   : > { %2493 = vadd.xlane.f32.xlu1 %v2492_v34 }
 0x676   : > { %v2491_v33 = vpop.xlane.xlu0 %2490 }
 0x677   : > { %v2495_v44 = vmul.f32 %v2491_v33, %v3261_v12 }
 0x679   : > { %v2497_v14 = vadd.f32 1e-05, %v2495_v44 }
 0x67b   : > { %3035 = vrsqrt.f32 %v2497_v14  ;;  %vm2505_vm10 = vweird.f32 %v2497_v14 }
 0x681   : > { %v3036_v11 = vpop.eup %3035 }
 0x682   : > { %v2500_v40 = vmul.f32 %v3036_v11, %v2497_v14  ;;  %vm2506_vm9 = vweird.f32 %v3036_v11 }
 0x683   : > { %vm2507_vm4 = vmor %vm2505_vm10, %vm2506_vm9 }
 0x684   : > { %v2501_v6 = vmul.f32 %v3036_v11, %v2500_v40  ;;  %v2494_v15 = vpop.xlane.xlu1 %2493 }
 0x685   : > { %v2496_v61 = vmul.f32 %v2494_v15, %v3261_v12 }
 0x686   : > { %v2502_v48 = vmul.f32 0.5, %v2501_v6 }
 0x687   : > { %v2498_v50 = vadd.f32 1e-05, %v2496_v61 }
 0x688   : > { %v2503_v28 = vsub.f32 1.5, %v2502_v48 }
 0x689   : > { %3037 = vrsqrt.f32 %v2498_v50  ;;  %vm2515_vm6 = vweird.f32 %v2498_v50 }
 0x68a   : > { %v2504_v30 = vmul.f32 %v3036_v11, %v2503_v28 }
 0x68c   : > { %v2508_v42 = vsel %vm2507_vm4, %v3036_v11, %v2504_v30 }
 0x68d   : > { %v2519_v46 = vmul.f32 %v2508_v42, %v2485_v60 }
 0x68f   : > { %v3038_v8 = vpop.eup %3037  ;;  %v2524_v35 = vmul.f32 %v2977_v24, %v2519_v46 }
 0x690   : > { %v2510_v18 = vmul.f32 %v3038_v8, %v2498_v50  ;;  %vm2516_vm5 = vweird.f32 %v3038_v8 }
 0x691   : > { %v2529_v39 = vadd.f32 %v2978_v53, %v2524_v35  ;;  %vm2517_vm7 = vmor %vm2515_vm6, %vm2516_vm5 }
 0x692   : > { %v2511_v56 = vmul.f32 %v3038_v8, %v2510_v18 }
 0x693   : > { %2905 = vmatmul.msk.f32.vlgmr.msrb.gmra.mxu0 %vm717_vm1, %v2529_v39 }
 0x694   : > { %v2512_v36 = vmul.f32 0.5, %v2511_v56 }
 0x696   : > { %v2513_v2 = vsub.f32 1.5, %v2512_v36 }
 0x698   : > { %v2514_v41 = vmul.f32 %v3038_v8, %v2513_v2 }
 0x69a   : > { %v2518_v17 = vsel %vm2517_vm7, %v3038_v8, %v2514_v41 }
 0x69b   : > { %v2520_v45 = vmul.f32 %v2518_v17, %v2486_v31 }
 0x69d   : > { %v2525_v57 = vmul.f32 %v2977_v24, %v2520_v45 }
 0x69f   : > { %v2530_v26 = vadd.f32 %v2978_v53, %v2525_v57 }
 0x6a1   : > { %2906 = vmatmul.msk.f32.gmra.mxu0 %vm717_vm1, %v2530_v26 }
 0x710   : > { %v2562_v7 = vpop.f32.mrf.mxu0 }
 0x711   : > { %v2563_v54 = vadd.f32 %v2979_v37, %v2562_v7 }
 0x713   : > { %v2568_v51 = vmax.f32 %v2563_v54, 0.0 }
 0x715   : > { %2907 = vmatmul.msk.f32.vlgmr.msra.gmra.mxu1 %vm2582_vm8, %v2568_v51 }
 0x71e   : > { %v2565_v23 = vpop.f32.mrf.mxu0 }
 0x71f   : > { %v2566_v55 = vadd.f32 %v2979_v37, %v2565_v23 }
 0x721   : > { %v2569_v32 = vmax.f32 %v2566_v55, 0.0 }
 0x723   : > { %2908 = vmatmul.msk.f32.gmra.mxu1 %vm2582_vm8, %v2569_v32 }
 0x792   : > { %v2606_v0 = vpop.f32.mrf.mxu1 }
 0x793   : > { %v2607_v16 = vadd.f32 %v2980_v63, %v2606_v0 }
 0x795   : > { %v2612_v1 = vadd.f32 %v2607_v16, %v4069_v10 }
 0x797   : > { %2614 = vst.msk [vmem:[%s4198_s24] sm:$0xff] %vm717_vm1, %v2612_v1 }
 0x7a0   : > { %v2609_v29 = vpop.f32.mrf.mxu1 }
 0x7a1   : > { %v2610_v4 = vadd.f32 %v2980_v63, %v2609_v29  ;;  %2619 = sbr.rel (%p2909_p6) target bundleno = 2235 (0x8bb), region = 88 }
 0x7a3   : > { %v2613_v60 = vadd.f32 %v2610_v4, %v4076_v38 }
 0x7a5   : > { %2615 = vst.msk [vmem:[%s4198_s24 + $0x8] sm:$0xff] %vm717_vm1, %v2613_v60  ;;  %s4221_s24 = sld [smem:[#allocation8_spill]] (!%p2909_p6) }
 0x7a6   : > { %v2622_v58 = vsel %vm717_vm1, %v2612_v1, 0.0  ;;  %v2625_v10 = vsel %vm717_vm1, %v2613_v60, 0.0  ;;  %v3042_v30 = vld [vmem:[%s4222_s16] ss:$0 sm:$0xff] }
 0x7a7   : > { %2623 = vadd.xlane.f32.xlu0 %v2622_v58 }
 0x7ab   : > { %v3041_v50 = vld [vmem:[%s4221_s24] ss:$0 sm:$0xff] }
 0x7af   : > { %2626 = vadd.xlane.f32.xlu0 %v2625_v10 }
 0x81a   : > { %v2624_v25 = vpop.xlane.xlu0 %2623 }
 0x81b   : > { %v2628_v49 = vmul.f32 %v2624_v25, %v3261_v12 }
 0x81d   : > { %v2630_v5 = vsub.f32 %v2612_v1, %v2628_v49 }
 0x81f   : > { %v2632_v31 = vmul.f32 %v2630_v5, %v2630_v5 }
 0x821   : > { %v2634_v38 = vsel %vm717_vm1, %v2632_v31, 0.0 }
 0x822   : > { %2635 = vadd.xlane.f32.xlu1 %v2634_v38  ;;  %v2627_v19 = vpop.xlane.xlu0 %2626 }
 0x823   : > { %v2629_v34 = vmul.f32 %v2627_v19, %v3261_v12 }
 0x825   : > { %v2631_v13 = vsub.f32 %v2613_v60, %v2629_v34 }
 0x827   : > { %v2633_v33 = vmul.f32 %v2631_v13, %v2631_v13 }
 0x829   : > { %v2637_v44 = vsel %vm717_vm1, %v2633_v33, 0.0 }
 0x82a   : > { %2638 = vadd.xlane.f32.xlu1 %v2637_v44 }
 0x895   : > { %v2636_v47 = vpop.xlane.xlu1 %2635 }
 0x896   : > { %v2640_v14 = vmul.f32 %v2636_v47, %v3261_v12 }
 0x898   : > { %v2642_v59 = vadd.f32 1e-05, %v2640_v14 }
 0x89a   : > { %3043 = vrsqrt.f32 %v2642_v59  ;;  %vm2650_vm11 = vweird.f32 %v2642_v59 }
 0x89d   : > { %v2639_v21 = vpop.xlane.xlu1 %2638 }
 0x89e   : > { %v2641_v11 = vmul.f32 %v2639_v21, %v3261_v12 }
 0x8a0   : > { %v3044_v62 = vpop.eup %3043  ;;  %v2643_v22 = vadd.f32 1e-05, %v2641_v11 }
 0x8a1   : > { %v2645_v40 = vmul.f32 %v3044_v62, %v2642_v59  ;;  %vm2651_vm12 = vweird.f32 %v3044_v62 }
 0x8a2   : > { %3045 = vrsqrt.f32 %v2643_v22  ;;  %vm2652_vm13 = vmor %vm2650_vm11, %vm2651_vm12  ;;  %vm2660_vm15 = vweird.f32 %v2643_v22 }
 0x8a3   : > { %v2646_v3 = vmul.f32 %v3044_v62, %v2645_v40 }
 0x8a5   : > { %v2647_v6 = vmul.f32 0.5, %v2646_v3 }
 0x8a7   : > { %v2648_v15 = vsub.f32 1.5, %v2647_v6 }
 0x8a8   : > { %v3046_v61 = vpop.eup %3045 }
 0x8a9   : > { %v2649_v27 = vmul.f32 %v3044_v62, %v2648_v15  ;;  %v2655_v48 = vmul.f32 %v3046_v61, %v2643_v22  ;;  %vm2661_vm14 = vweird.f32 %v3046_v61 }
 0x8aa   : > { %vm2662_vm0 = vmor %vm2660_vm15, %vm2661_vm14 }
 0x8ab   : > { %v2653_v20 = vsel %vm2652_vm13, %v3044_v62, %v2649_v27  ;;  %v2656_v28 = vmul.f32 %v3046_v61, %v2655_v48 }
 0x8ac   : > { %v2664_v12 = vmul.f32 %v2653_v20, %v2630_v5 }
 0x8ad   : > { %v2657_v24 = vmul.f32 0.5, %v2656_v28 }
 0x8ae   : > { %v2669_v42 = vmul.f32 %v3041_v50, %v2664_v12 }
 0x8af   : > { %v2658_v46 = vsub.f32 1.5, %v2657_v24 }
 0x8b0   : > { %v2674_v53 = vadd.f32 %v3042_v30, %v2669_v42 }
 0x8b1   : > { %v2659_v8 = vmul.f32 %v3046_v61, %v2658_v46 }
 0x8b2   : > { %2676 = vst.msk [vmem:[%s4223_s17] sm:$0xff] %vm717_vm1, %v2674_v53 }
 0x8b3   : > { %v2663_v35 = vsel %vm2662_vm0, %v3046_v61, %v2659_v8 }
 0x8b4   : > { %v2665_v18 = vmul.f32 %v2663_v35, %v2631_v13 }
 0x8b6   : > { %v2670_v39 = vmul.f32 %v3041_v50, %v2665_v18 }
 0x8b8   : > { %v2675_v56 = vadd.f32 %v3042_v30, %v2670_v39 }
 0x8ba   : > { %2677 = vst.msk [vmem:[%s4223_s17 + $0x8] sm:$0xff] %vm717_vm1, %v2675_v56 }
 0x8bb PF: > { %s4224_s15 = sld [smem:[#allocation3_spill]] }
 0x8bc   : > { %s4225_s18 = sld [smem:[#allocation2_spill]] }
 0x8bd   : > { %s4226_s19 = sld [smem:[#allocation4_spill]] }
 0x8c1   : > { %s25_s20 = sadd.s32 1, %s4224_s15  }
 0x8c2   : > { %p22_p7 = scmp.ge.s32.totalorder %s25_s20, 4  }
 0x8c4   :  { %24 = sbr.rel (!%p22_p7) target bundleno = 6 (0x6), region = 154 }

</bundles_post_ra>
